<compile_context>
chip_gen: v6e
topology: v6e:2x2x1
jax: 0.10.0
libtpu: 0.0.40
codegen_flags: <defaults>
</compile_context>

<pallas_src>
import jax
import jax.numpy as jnp
from jax.experimental import pallas as pl
from jax.experimental.pallas import tpu as pltpu


def ncfg_kernel(hist_ref, item_ref, heads_ref, rels_ref, tails_ref,
                wih_ref, whh_ref, bih_ref, bhh_ref, out_ref):
    TB, H, D = hist_ref.shape
    L, _, K, _ = heads_ref.shape
    LBK = L * TB * K

    # user embedding: sum of history entity embeddings
    user_emb = jnp.sum(hist_ref[...], axis=1)                          # (TB, D)

    # RNN params in x @ W form; split w_ih into head/tail half and relation
    # half so no lane-axis concat is needed inside the kernel.
    wih = wih_ref[...]                                                 # (2D, D)
    w_a = wih[:D, :]
    w_b = wih[D:, :]
    whh = whh_ref[...]                                                 # (D, D)
    bias_sum = bih_ref[...] + bhh_ref[...]                             # (1, D), hoisted

    h = heads_ref[...]                                                 # (L, TB, K, D)
    r = rels_ref[...]
    tl = tails_ref[...]

    # attention: pi = softmax_K(<[h,r],[t,r]>) = softmax_K(<h,t> + <r,r>)
    logits = jnp.sum(h * tl, axis=-1) + jnp.sum(r * r, axis=-1)        # (L, TB, K)
    logits = logits - jnp.max(logits, axis=-1, keepdims=True)
    e = jnp.exp(logits)
    pi = e * pl.reciprocal(jnp.sum(e, axis=-1, keepdims=True), approx=True)

    # 2-step ReLU RNN over the sequence ([h,r], [t,r]) with h0 = 0,
    # batched over all hops / samples / neighbors in one shot.
    h2d = h.reshape(LBK, D)
    r2d = r.reshape(LBK, D)
    t2d = tl.reshape(LBK, D)
    # single matmul for both RNN-step inputs (head rows stacked over tail rows)
    ht_proj = jnp.dot(jnp.concatenate([h2d, t2d], axis=0), w_a,
                      preferred_element_type=jnp.float32)              # (2*LBK, D)
    r_proj = jnp.dot(r2d, w_b, preferred_element_type=jnp.float32)     # (LBK, D)
    h1 = jnp.maximum(ht_proj[:LBK] + r_proj + bias_sum, 0.0)           # (LBK, D)
    h2 = jnp.maximum(ht_proj[LBK:] + r_proj + bias_sum
                     + jnp.dot(h1, whh, preferred_element_type=jnp.float32),
                     0.0)                                              # (LBK, D)
    triple = h2.reshape(L, TB, K, D)

    # item embedding: item + sum over hops of pi-weighted triples
    item_acc = item_ref[...] + jnp.sum(pi[..., None] * triple, axis=(0, 2))  # (TB, D)

    pred = jax.nn.sigmoid(jnp.sum(user_emb * item_acc, axis=1, keepdims=True))  # (TB, 1)
    # lane-dense store: broadcast prediction across the 128 output lanes
    out_ref[...] = jnp.broadcast_to(pred, out_ref.shape)


def ncfg_forward(hist_emb, item_emb, heads, rels, tails,
                 w_ih, w_hh, b_ih, b_hh, *, max_tile_b=128):
    L, B, K, D = heads.shape
    H = hist_emb.shape[1]

    # batch tile: multiple of 8 sublanes, capped at max_tile_b (keeps the
    # per-tile working set comfortably inside the 32 MiB scoped VMEM limit,
    # including the 64 MiB-VMEM v7x case).
    TB = min(max_tile_b, max(8, ((B + 7) // 8) * 8))
    n_blocks = pl.cdiv(B, TB)
    B_pad = n_blocks * TB
    pad = B_pad - B
    if pad:
        hist_emb = jnp.pad(hist_emb, ((0, pad), (0, 0), (0, 0)))
        item_emb = jnp.pad(item_emb, ((0, pad), (0, 0)))
        pad4 = ((0, 0), (0, pad), (0, 0), (0, 0))
        heads = jnp.pad(heads, pad4)
        rels = jnp.pad(rels, pad4)
        tails = jnp.pad(tails, pad4)

    out = pl.pallas_call(
        ncfg_kernel,
        out_shape=jax.ShapeDtypeStruct((B_pad, 128), jnp.float32),
        grid=(n_blocks,),
        in_specs=[
            pl.BlockSpec((TB, H, D), lambda b: (b, 0, 0)),        # hist_emb
            pl.BlockSpec((TB, D), lambda b: (b, 0)),              # item_emb
            pl.BlockSpec((L, TB, K, D), lambda b: (0, b, 0, 0)),  # heads
            pl.BlockSpec((L, TB, K, D), lambda b: (0, b, 0, 0)),  # rels
            pl.BlockSpec((L, TB, K, D), lambda b: (0, b, 0, 0)),  # tails
            pl.BlockSpec((2 * D, D), lambda b: (0, 0)),           # w_ih (resident)
            pl.BlockSpec((D, D), lambda b: (0, 0)),               # w_hh (resident)
            pl.BlockSpec((1, D), lambda b: (0, 0)),               # b_ih (resident)
            pl.BlockSpec((1, D), lambda b: (0, 0)),               # b_hh (resident)
        ],
        out_specs=pl.BlockSpec((TB, 128), lambda b: (b, 0)),
        compiler_params=pltpu.CompilerParams(
            dimension_semantics=("parallel",),
            vmem_limit_bytes=32 * 1024 * 1024,
        ),
    )(hist_emb, item_emb, heads, rels, tails, w_ih, w_hh, b_ih, b_hh)
    return out[:B, 0]


def reference(hist_emb, item_emb, heads, rels, tails, w_ih, w_hh, b_ih, b_hh):
    """Plain-JAX mirror of the torch forward (concat form) for verification."""
    L, B, K, D = heads.shape
    user_emb = hist_emb.sum(axis=1)
    item_acc = item_emb
    for i in range(L):
        h, r, tl = heads[i], rels[i], tails[i]
        hr = jnp.concatenate([h, r], axis=-1)
        tr = jnp.concatenate([tl, r], axis=-1)
        pi = jax.nn.softmax(jnp.sum(hr * tr, axis=-1, keepdims=True), axis=1)
        x1 = hr.reshape(-1, 2 * D) @ w_ih
        h1 = jnp.maximum(x1 + b_ih + b_hh, 0.0)
        x2 = tr.reshape(-1, 2 * D) @ w_ih
        h2 = jnp.maximum(x2 + b_ih + h1 @ w_hh + b_hh, 0.0)
        triple = h2.reshape(B, K, D)
        item_acc = item_acc + jnp.sum(pi * triple, axis=1)
    return jax.nn.sigmoid(jnp.sum(user_emb * item_acc, axis=1))


if __name__ == "__main__":
    dim, n_entity, n_relation, L = 32, 64, 16, 2
    n_user, B, K, H = 10, 4, 8, 5

    key = jax.random.PRNGKey(0)
    ks = jax.random.split(key, 12)

    def xavier(k, shape):
        bound = jnp.sqrt(6.0 / (shape[0] + shape[1]))
        return jax.random.uniform(k, shape, jnp.float32, -bound, bound)

    # deterministic parameter init (shapes follow the module's __init__)
    entity_emb = xavier(ks[0], (n_entity, dim))
    relation_emb = xavier(ks[1], (n_relation, dim))
    w_ih = xavier(ks[2], (2 * dim, dim))          # = torch weight_ih_l0.T
    w_hh = xavier(ks[3], (dim, dim))              # = torch weight_hh_l0.T
    b_ih = xavier(ks[4], (1, dim))
    b_hh = xavier(ks[5], (1, dim))

    # synthetic pairs / history_dict / ripple_sets (as dense index tables)
    users = jax.random.randint(ks[6], (B,), 0, n_user)
    items = jax.random.randint(ks[7], (B,), 0, n_entity)
    history = jax.random.randint(ks[8], (n_user, H), 0, n_entity)
    ripple_heads = jax.random.randint(ks[9], (n_entity, L, K), 0, n_entity)
    ripple_rels = jax.random.randint(ks[10], (n_entity, L, K), 0, n_relation)
    ripple_tails = jax.random.randint(ks[11], (n_entity, L, K), 0, n_entity)

    # glue: embedding gathers (equivalent of the python-dict lookups)
    hist_emb = entity_emb[history[users]]                                   # (B, H, D)
    item_emb = entity_emb[items]                                            # (B, D)
    heads = jnp.transpose(entity_emb[ripple_heads[items]], (1, 0, 2, 3))    # (L,B,K,D)
    rels = jnp.transpose(relation_emb[ripple_rels[items]], (1, 0, 2, 3))    # (L,B,K,D)
    tails = jnp.transpose(entity_emb[ripple_tails[items]], (1, 0, 2, 3))    # (L,B,K,D)

    out = ncfg_forward(hist_emb, item_emb, heads, rels, tails,
                       w_ih, w_hh, b_ih, b_hh)
    out = jax.block_until_ready(out)

    ref = reference(hist_emb, item_emb, heads, rels, tails,
                    w_ih, w_hh, b_ih, b_hh)
    assert out.shape == (B,)
    # tolerance loosened slightly vs. 1e-5 to cover the approx-reciprocal softmax
    assert jnp.allclose(out, ref, atol=2e-3, rtol=2e-3), (out, ref)
    print("KERNEL_OK")
</pallas_src>

<mosaic_0001>
module attributes {stable_mosaic.version = 11 : i64} {
  func.func @ncfg_kernel(%arg0: i32, %arg1: memref<8x5x32xf32, #tpu.memory_space<vmem>>, %arg2: memref<8x32xf32, #tpu.memory_space<vmem>>, %arg3: memref<2x8x8x32xf32, #tpu.memory_space<vmem>>, %arg4: memref<2x8x8x32xf32, #tpu.memory_space<vmem>>, %arg5: memref<2x8x8x32xf32, #tpu.memory_space<vmem>>, %arg6: memref<64x32xf32, #tpu.memory_space<vmem>>, %arg7: memref<32x32xf32, #tpu.memory_space<vmem>>, %arg8: memref<1x32xf32, #tpu.memory_space<vmem>>, %arg9: memref<1x32xf32, #tpu.memory_space<vmem>>, %arg10: memref<8x128xf32, #tpu.memory_space<vmem>>) attributes {dimension_semantics = [#tpu.dimension_semantics<parallel>], iteration_bounds = array<i64: 1>, scalar_prefetch = 0 : i64, scratch_operands = 0 : i64, tpu.core_type = #tpu.core_type<tc>, window_params = [{transform_indices = @transform_0, window_bounds = array<i64: 8, 5, 32>}, {transform_indices = @transform_1, window_bounds = array<i64: 8, 32>}, {transform_indices = @transform_2, window_bounds = array<i64: 2, 8, 8, 32>}, {transform_indices = @transform_3, window_bounds = array<i64: 2, 8, 8, 32>}, {transform_indices = @transform_4, window_bounds = array<i64: 2, 8, 8, 32>}, {pipeline_mode = #tpu.pipeline_mode<synchronous>, transform_indices = @transform_5, window_bounds = array<i64: 64, 32>}, {pipeline_mode = #tpu.pipeline_mode<synchronous>, transform_indices = @transform_6, window_bounds = array<i64: 32, 32>}, {pipeline_mode = #tpu.pipeline_mode<synchronous>, transform_indices = @transform_7, window_bounds = array<i64: 1, 32>}, {pipeline_mode = #tpu.pipeline_mode<synchronous>, transform_indices = @transform_8, window_bounds = array<i64: 1, 32>}, {transform_indices = @transform_9, window_bounds = array<i64: 8, 128>}]} {
    %c0 = arith.constant 0 : index
    %c0_0 = arith.constant 0 : index
    %c0_1 = arith.constant 0 : index
    %0 = vector.load %arg1[%c0, %c0_0, %c0_1] : memref<8x5x32xf32, #tpu.memory_space<vmem>>, vector<8x5x32xf32>
    %cst = arith.constant dense<0.000000e+00> : vector<8x32xf32>
    %1 = vector.multi_reduction <add>, %0, %cst [1] : vector<8x5x32xf32> to vector<8x32xf32>
    %c0_2 = arith.constant 0 : index
    %c0_3 = arith.constant 0 : index
    %2 = vector.load %arg6[%c0_2, %c0_3] : memref<64x32xf32, #tpu.memory_space<vmem>>, vector<64x32xf32>
    %3 = vector.extract_strided_slice %2 {offsets = [0, 0], sizes = [32, 32], strides = [1, 1]} : vector<64x32xf32> to vector<32x32xf32>
    %4 = vector.extract_strided_slice %2 {offsets = [32, 0], sizes = [32, 32], strides = [1, 1]} : vector<64x32xf32> to vector<32x32xf32>
    %c0_4 = arith.constant 0 : index
    %c0_5 = arith.constant 0 : index
    %5 = vector.load %arg7[%c0_4, %c0_5] : memref<32x32xf32, #tpu.memory_space<vmem>>, vector<32x32xf32>
    %c0_6 = arith.constant 0 : index
    %c0_7 = arith.constant 0 : index
    %6 = vector.load %arg8[%c0_6, %c0_7] : memref<1x32xf32, #tpu.memory_space<vmem>>, vector<1x32xf32>
    %c0_8 = arith.constant 0 : index
    %c0_9 = arith.constant 0 : index
    %7 = vector.load %arg9[%c0_8, %c0_9] : memref<1x32xf32, #tpu.memory_space<vmem>>, vector<1x32xf32>
    %8 = arith.addf %6, %7 : vector<1x32xf32>
    %c0_10 = arith.constant 0 : index
    %c0_11 = arith.constant 0 : index
    %c0_12 = arith.constant 0 : index
    %c0_13 = arith.constant 0 : index
    %9 = vector.load %arg3[%c0_10, %c0_11, %c0_12, %c0_13] : memref<2x8x8x32xf32, #tpu.memory_space<vmem>>, vector<2x8x8x32xf32>
    %c0_14 = arith.constant 0 : index
    %c0_15 = arith.constant 0 : index
    %c0_16 = arith.constant 0 : index
    %c0_17 = arith.constant 0 : index
    %10 = vector.load %arg4[%c0_14, %c0_15, %c0_16, %c0_17] : memref<2x8x8x32xf32, #tpu.memory_space<vmem>>, vector<2x8x8x32xf32>
    %c0_18 = arith.constant 0 : index
    %c0_19 = arith.constant 0 : index
    %c0_20 = arith.constant 0 : index
    %c0_21 = arith.constant 0 : index
    %11 = vector.load %arg5[%c0_18, %c0_19, %c0_20, %c0_21] : memref<2x8x8x32xf32, #tpu.memory_space<vmem>>, vector<2x8x8x32xf32>
    %12 = arith.mulf %9, %11 : vector<2x8x8x32xf32>
    %cst_22 = arith.constant dense<0.000000e+00> : vector<2x8x8xf32>
    %13 = vector.multi_reduction <add>, %12, %cst_22 [3] : vector<2x8x8x32xf32> to vector<2x8x8xf32>
    %14 = arith.mulf %10, %10 : vector<2x8x8x32xf32>
    %cst_23 = arith.constant dense<0.000000e+00> : vector<2x8x8xf32>
    %15 = vector.multi_reduction <add>, %14, %cst_23 [3] : vector<2x8x8x32xf32> to vector<2x8x8xf32>
    %16 = arith.addf %13, %15 : vector<2x8x8xf32>
    %cst_24 = arith.constant dense<0xFF800000> : vector<2x8xf32>
    %17 = vector.multi_reduction <maximumf>, %16, %cst_24 [2] : vector<2x8x8xf32> to vector<2x8xf32>
    %18 = vector.shape_cast %17 : vector<2x8xf32> to vector<2x8x1xf32>
    %19 = vector.broadcast %18 : vector<2x8x1xf32> to vector<2x8x8xf32>
    %20 = arith.subf %16, %19 : vector<2x8x8xf32>
    %21 = math.exp %20 : vector<2x8x8xf32>
    %cst_25 = arith.constant dense<0.000000e+00> : vector<2x8xf32>
    %22 = vector.multi_reduction <add>, %21, %cst_25 [2] : vector<2x8x8xf32> to vector<2x8xf32>
    %23 = vector.shape_cast %22 : vector<2x8xf32> to vector<2x8x1xf32>
    %24 = tpu.reciprocal %23 {approx = true} : vector<2x8x1xf32> -> vector<2x8x1xf32>
    %25 = vector.broadcast %24 : vector<2x8x1xf32> to vector<2x8x8xf32>
    %26 = arith.mulf %21, %25 : vector<2x8x8xf32>
    %27 = vector.shape_cast %9 : vector<2x8x8x32xf32> to vector<128x32xf32>
    %28 = vector.shape_cast %10 : vector<2x8x8x32xf32> to vector<128x32xf32>
    %29 = vector.shape_cast %11 : vector<2x8x8x32xf32> to vector<128x32xf32>
    %30 = tpu.concatenate %27, %29 in 0 : vector<128x32xf32>, vector<128x32xf32> -> vector<256x32xf32>
    %cst_26 = arith.constant dense<0.000000e+00> : vector<256x32xf32>
    %31 = tpu.matmul %30, %3, %cst_26 {dimension_numbers = #tpu.dot_dimension_numbers<[1], [0], [0], [1], [0, 0, 1, 1], [], []>} : vector<256x32xf32>, vector<32x32xf32>, vector<256x32xf32> -> vector<256x32xf32>
    %cst_27 = arith.constant dense<0.000000e+00> : vector<128x32xf32>
    %32 = tpu.matmul %28, %4, %cst_27 {dimension_numbers = #tpu.dot_dimension_numbers<[1], [0], [0], [1], [0, 0, 1, 1], [], []>} : vector<128x32xf32>, vector<32x32xf32>, vector<128x32xf32> -> vector<128x32xf32>
    %33 = vector.extract_strided_slice %31 {offsets = [0, 0], sizes = [128, 32], strides = [1, 1]} : vector<256x32xf32> to vector<128x32xf32>
    %34 = arith.addf %33, %32 : vector<128x32xf32>
    %35 = vector.broadcast %8 : vector<1x32xf32> to vector<128x32xf32>
    %36 = arith.addf %34, %35 : vector<128x32xf32>
    %cst_28 = arith.constant 0.000000e+00 : f32
    %37 = vector.broadcast %cst_28 : f32 to vector<128x32xf32>
    %38 = arith.maximumf %36, %37 : vector<128x32xf32>
    %39 = vector.extract_strided_slice %31 {offsets = [128, 0], sizes = [128, 32], strides = [1, 1]} : vector<256x32xf32> to vector<128x32xf32>
    %40 = arith.addf %39, %32 : vector<128x32xf32>
    %41 = vector.broadcast %8 : vector<1x32xf32> to vector<128x32xf32>
    %42 = arith.addf %40, %41 : vector<128x32xf32>
    %cst_29 = arith.constant dense<0.000000e+00> : vector<128x32xf32>
    %43 = tpu.matmul %38, %5, %cst_29 {dimension_numbers = #tpu.dot_dimension_numbers<[1], [0], [0], [1], [0, 0, 1, 1], [], []>} : vector<128x32xf32>, vector<32x32xf32>, vector<128x32xf32> -> vector<128x32xf32>
    %44 = arith.addf %42, %43 : vector<128x32xf32>
    %cst_30 = arith.constant 0.000000e+00 : f32
    %45 = vector.broadcast %cst_30 : f32 to vector<128x32xf32>
    %46 = arith.maximumf %44, %45 : vector<128x32xf32>
    %47 = vector.shape_cast %46 : vector<128x32xf32> to vector<2x8x8x32xf32>
    %c0_31 = arith.constant 0 : index
    %c0_32 = arith.constant 0 : index
    %48 = vector.load %arg2[%c0_31, %c0_32] : memref<8x32xf32, #tpu.memory_space<vmem>>, vector<8x32xf32>
    %49 = vector.shape_cast %26 : vector<2x8x8xf32> to vector<2x8x8x1xf32>
    %50 = vector.broadcast %49 : vector<2x8x8x1xf32> to vector<2x8x8x32xf32>
    %51 = arith.mulf %50, %47 : vector<2x8x8x32xf32>
    %cst_33 = arith.constant dense<0.000000e+00> : vector<8x32xf32>
    %52 = vector.multi_reduction <add>, %51, %cst_33 [0, 2] : vector<2x8x8x32xf32> to vector<8x32xf32>
    %53 = arith.addf %48, %52 : vector<8x32xf32>
    %54 = arith.mulf %1, %53 : vector<8x32xf32>
    %cst_34 = arith.constant dense<0.000000e+00> : vector<8xf32>
    %55 = vector.multi_reduction <add>, %54, %cst_34 [1] : vector<8x32xf32> to vector<8xf32>
    %56 = vector.shape_cast %55 : vector<8xf32> to vector<8x1xf32>
    %57 = arith.negf %56 : vector<8x1xf32>
    %58 = math.exp %57 : vector<8x1xf32>
    %cst_35 = arith.constant 1.000000e+00 : f32
    %59 = vector.broadcast %cst_35 : f32 to vector<8x1xf32>
    %60 = arith.addf %59, %58 : vector<8x1xf32>
    %61 = arith.divf %59, %60 : vector<8x1xf32>
    %62 = vector.shape_cast %61 : vector<8x1xf32> to vector<8x1xf32>
    %63 = vector.broadcast %62 : vector<8x1xf32> to vector<8x128xf32>
    %c0_36 = arith.constant 0 : index
    %c0_37 = arith.constant 0 : index
    %64 = vector.load %arg10[%c0_36, %c0_37] : memref<8x128xf32, #tpu.memory_space<vmem>>, vector<8x128xf32>
    tpu.vector_store %arg10[%c0_36, %c0_37], %63 {strides = array<i32>} : memref<8x128xf32, #tpu.memory_space<vmem>>, vector<8x128xf32>,
    return
  }
  func.func @transform_0(%arg0: i32) -> (i32, i32, i32) {
    %c0_i32 = arith.constant 0 : i32
    %c0_i32_0 = arith.constant 0 : i32
    %c0_i32_1 = arith.constant 0 : i32
    return %arg0, %c0_i32, %c0_i32_0 : i32, i32, i32
  }
  func.func @transform_1(%arg0: i32) -> (i32, i32) {
    %c0_i32 = arith.constant 0 : i32
    %c0_i32_0 = arith.constant 0 : i32
    return %arg0, %c0_i32 : i32, i32
  }
  func.func @transform_2(%arg0: i32) -> (i32, i32, i32, i32) {
    %c0_i32 = arith.constant 0 : i32
    %c0_i32_0 = arith.constant 0 : i32
    %c0_i32_1 = arith.constant 0 : i32
    %c0_i32_2 = arith.constant 0 : i32
    return %c0_i32, %arg0, %c0_i32_0, %c0_i32_1 : i32, i32, i32, i32
  }
  func.func @transform_3(%arg0: i32) -> (i32, i32, i32, i32) {
    %c0_i32 = arith.constant 0 : i32
    %c0_i32_0 = arith.constant 0 : i32
    %c0_i32_1 = arith.constant 0 : i32
    %c0_i32_2 = arith.constant 0 : i32
    return %c0_i32, %arg0, %c0_i32_0, %c0_i32_1 : i32, i32, i32, i32
  }
  func.func @transform_4(%arg0: i32) -> (i32, i32, i32, i32) {
    %c0_i32 = arith.constant 0 : i32
    %c0_i32_0 = arith.constant 0 : i32
    %c0_i32_1 = arith.constant 0 : i32
    %c0_i32_2 = arith.constant 0 : i32
    return %c0_i32, %arg0, %c0_i32_0, %c0_i32_1 : i32, i32, i32, i32
  }
  func.func @transform_5(%arg0: i32) -> (i32, i32) {
    %c0_i32 = arith.constant 0 : i32
    %c0_i32_0 = arith.constant 0 : i32
    %c0_i32_1 = arith.constant 0 : i32
    return %c0_i32, %c0_i32_0 : i32, i32
  }
  func.func @transform_6(%arg0: i32) -> (i32, i32) {
    %c0_i32 = arith.constant 0 : i32
    %c0_i32_0 = arith.constant 0 : i32
    %c0_i32_1 = arith.constant 0 : i32
    return %c0_i32, %c0_i32_0 : i32, i32
  }
  func.func @transform_7(%arg0: i32) -> (i32, i32) {
    %c0_i32 = arith.constant 0 : i32
    %c0_i32_0 = arith.constant 0 : i32
    %c0_i32_1 = arith.constant 0 : i32
    return %c0_i32, %c0_i32_0 : i32, i32
  }
  func.func @transform_8(%arg0: i32) -> (i32, i32) {
    %c0_i32 = arith.constant 0 : i32
    %c0_i32_0 = arith.constant 0 : i32
    %c0_i32_1 = arith.constant 0 : i32
    return %c0_i32, %c0_i32_0 : i32, i32
  }
  func.func @transform_9(%arg0: i32) -> (i32, i32) {
    %c0_i32 = arith.constant 0 : i32
    %c0_i32_0 = arith.constant 0 : i32
    return %arg0, %c0_i32 : i32, i32
  }
}

</mosaic_0001>

<bundles_post_ra>
// kernel: tpu_custom_call.1
= control target key start
LH: loop header
LB: loop body
LE: loop exit
PB: predicated region body
PF: predicated region fallthrough
CT: control target
= control target key end

     0   :  { %14 = vsyncpa [#allocation3], 0  ;;  %s3202_s0 = inlined_call_operand.vmem [shape: f32[8,5,32], index: 0, kind: input, shape index: {}]   ;;  %s3203_s1 = inlined_call_operand.vmem [shape: f32[8,32], index: 1, kind: input, shape index: {}]   ;;  %s3204_s2 = inlined_call_operand.vmem [shape: f32[2,8,8,32], index: 2, kind: input, shape index: {}]   ;;  %s3205_s3 = inlined_call_operand.hbm [shape: f32[2,8,8,32], index: 3, kind: input, shape index: {}]   ;;  %s3206_s4 = inlined_call_operand.hbm [shape: f32[2,8,8,32], index: 4, kind: input, shape index: {}]   ;;  %s3207_s5 = inlined_call_operand.vmem [shape: f32[64,32], index: 5, kind: input, shape index: {}]   ;;  %s3208_s6 = inlined_call_operand.vmem [shape: f32[32,32], index: 6, kind: input, shape index: {}]   ;;  %s3209_s7 = inlined_call_operand.vmem [shape: f32[1,32], index: 7, kind: input, shape index: {}]   ;;  %s3210_s8 = inlined_call_operand.vmem [shape: f32[1,32], index: 8, kind: input, shape index: {}]   ;;  %s3211_s9 = inlined_call_operand.hbm [shape: f32[8,128], index: 9, kind: output, shape index: {}]  }
   0x1   :  { %15 = vsyncpa [#allocation6], 0 }
   0x2   :  { %16 = vsyncpa [#allocation4], 0  ;;  %s2285_s30 = smov [#allocation2]  }
   0x3   :  { %s28_s10 = sshll.u32 %s2285_s30, 4  ;;  %s29_s10 = int_to_ptr.vmem [resolvable:$true] %s28_s10 }
   0x4   :  { %s2227_s11 = scalar_lea.vmem %s29_s10, 2048  ;;  %p2232_p1 = scmp.lt.s32.totalorder %s29_s10, %s29_s10 }
   0x5   :  { %p2228_p0 = scmp.ne.s32.totalorder %s29_s10, %s2227_s11  ;;  %p2233_p2 = scmp.lt.s32.totalorder %s2227_s11, %s2227_s11 }
   0x7   :  { %p2234_p3 = por %p2233_p2, %p2232_p1 }
   0x9   :  { %p2235_p4 = pnand %p2234_p3, %p2228_p0 }
   0xb   :  { %2238 = shalt.err (!%p2235_p4)
}
   0xc   :  { %s2286_s12 = smov 128   ;;  %s2287_s13 = smov 8  }
   0xd   :  { %34 = dma.hbm_to_vmem [thread:$0]  %s3205_s3, 2048, %s29_s10, [#allocation3], %s2286_s12, %s2286_s12, %s2287_s13  }
   0xe   :  { %s2288_s16 = smov [#allocation5]  }
   0xf   :  { %s40_s17 = sshll.u32 %s2288_s16, 4  ;;  %s41_s17 = int_to_ptr.vmem [resolvable:$true] %s40_s17 }
  0x10   :  { %s2247_s18 = scalar_lea.vmem %s41_s17, 2048  ;;  %p2252_p6 = scmp.lt.s32.totalorder %s41_s17, %s41_s17 }
  0x11   :  { %p2248_p5 = scmp.ne.s32.totalorder %s41_s17, %s2247_s18  ;;  %p2253_p7 = scmp.lt.s32.totalorder %s2247_s18, %s2247_s18 }
  0x13   :  { %p2254_p8 = por %p2253_p7, %p2252_p6 }
  0x15   :  { %p2255_p9 = pnand %p2254_p8, %p2248_p5 }
  0x17   :  { %2258 = shalt.err (!%p2255_p9)
}
  0x18   :  { %46 = dma.hbm_to_vmem [thread:$0]  %s3206_s4, 2048, %s41_s17, [#allocation6], %s2286_s12, %s2286_s12, %s2287_s13  }
  0x19   :  { %2279 = dma.done.wait [#allocation3], 2048  }
  0x1a   :  { %2280 = vsyncadd [#allocation3], 4294965248 }
  0x1b   :  { %2281 = dma.done.wait [#allocation6], 2048  }
  0x1c   :  { %2282 = vsyncadd [#allocation6], 4294965248  ;;  %v2350_v0 = vld [vmem:[%s3204_s2 + $0x40] sm:$0xff]  ;;  %vm205_vm0 = vcmask 261120   ;;  %v2364_v5 = vld [vmem:[%s3204_s2 + $0x48] sm:$0xff]  ;;  %vm416_vm1 = vcmask 1041409  }
  0x1d   :  { %v2352_v1 = vld [vmem:[#allocation5 + $0x40] sm:$0xff]  ;;  %v2366_v6 = vld [vmem:[#allocation5 + $0x48] sm:$0xff]  ;;  %v2403_v26 = vld [vmem:[%s3204_s2 + $0x50] sm:$0xff]  ;;  %vm418_vm2 = vcmask 1042434   ;;  %vm420_vm3 = vcmask 1043459   ;;  %vm422_vm4 = vcmask 1044484  }
  0x1e   :  { %v141_v2 = vld [vmem:[%s3204_s2] sm:$0xff]  ;;  %v197_v3 = vmul.f32 %v2352_v1, %v2350_v0  ;;  %v198_v8 = vmul.f32 %v2366_v6, %v2364_v5  ;;  %v2375_v9 = vld [vmem:[%s3204_s2 + $0x8] sm:$0xff]  ;;  %v2405_v27 = vld [vmem:[#allocation5 + $0x50] sm:$0xff]  ;;  %vm424_vm5 = vcmask 1045509   ;;  %vm426_vm6 = vcmask 1046534  }
  0x1f   :  { %v2359_v4 = vld [vmem:[#allocation5] sm:$0xff]  ;;  %2059 = vmatprep.mubr.msk.f32.mxu0 %vm205_vm0, %v141_v2  ;;  %v2377_v10 = vld [vmem:[#allocation5 + $0x8] sm:$0xff]  ;;  %v2410_v28 = vld [vmem:[%s3204_s2 + $0x10] sm:$0xff]  ;;  %v199_v31 = vmul.f32 %v2405_v27, %v2403_v26  ;;  %vm428_vm7 = vcmask 1047559   ;;  %vm439_vm8 = vcmask 64512   ;;  %vm69_vm9 = vcmask 258048  }
  0x20   :  { %v189_v7 = vmul.f32 %v2359_v4, %v141_v2  ;;  %v2379_v11 = vld [vmem:[#allocation2 + $0x8] sm:$0xff]  ;;  %v230_v12 = vsel %vm205_vm0, %v197_v3, 0.0  ;;  %v190_v13 = vmul.f32 %v2377_v10, %v2375_v9  ;;  %v157_v14 = vld [vmem:[#allocation2] sm:$0xff]  ;;  %v233_v16 = vsel %vm205_vm0, %v198_v8, 0.0  ;;  %v2412_v29 = vld [vmem:[#allocation5 + $0x10] sm:$0xff] }
  0x21   :  { %231 = vadd.xlane.f32.xlu1 %v230_v12  ;;  %2115 = vmatprep.mubr.msk.f32.mxu1 %vm205_vm0, %v157_v14  ;;  %v255_v17 = vmul.f32 %v2379_v11, %v2379_v11  ;;  %v254_v19 = vmul.f32 %v157_v14, %v157_v14  ;;  %v2390_v20 = vld [vmem:[#allocation2 + $0x48] sm:$0xff]  ;;  %v2392_v21 = vld [vmem:[#allocation2 + $0x40] sm:$0xff]  ;;  %v191_v33 = vmul.f32 %v2412_v29, %v2410_v28  ;;  %v2420_v34 = vld [vmem:[#allocation2 + $0x50] sm:$0xff]  ;;  %v236_v36 = vsel %vm205_vm0, %v199_v31, 0.0 }
  0x22   :  { %v206_v15 = vsel %vm205_vm0, %v189_v7, 0.0  ;;  %v209_v18 = vsel %vm205_vm0, %v190_v13, 0.0  ;;  %v263_v23 = vmul.f32 %v2390_v20, %v2390_v20  ;;  %v262_v25 = vmul.f32 %v2392_v21, %v2392_v21  ;;  %v2422_v35 = vld [vmem:[#allocation2 + $0x10] sm:$0xff]  ;;  %v2433_v40 = vld [vmem:[%s3204_s2 + $0x58] sm:$0xff]  ;;  %v2463_v54 = vld [vmem:[%s3204_s2 + $0x60] sm:$0xff] }
  0x23   :  { %207 = vadd.xlane.f32.xlu0 %v206_v15  ;;  %v273_v22 = vsel %vm205_vm0, %v255_v17, 0.0  ;;  %v270_v24 = vsel %vm205_vm0, %v254_v19, 0.0  ;;  %v264_v37 = vmul.f32 %v2420_v34, %v2420_v34  ;;  %v212_v38 = vsel %vm205_vm0, %v191_v33, 0.0  ;;  %v2435_v41 = vld [vmem:[#allocation5 + $0x58] sm:$0xff]  ;;  %v2465_v55 = vld [vmem:[#allocation5 + $0x60] sm:$0xff]  ;;  %v2493_v12 = vld [vmem:[%s3204_s2 + $0x68] sm:$0xff] }
  0x24   :  { %v297_v30 = vsel %vm205_vm0, %v263_v23, 0.0  ;;  %v294_v32 = vsel %vm205_vm0, %v262_v25, 0.0  ;;  %v256_v39 = vmul.f32 %v2422_v35, %v2422_v35  ;;  %v2440_v42 = vld [vmem:[%s3204_s2 + $0x18] sm:$0xff]  ;;  %v200_v45 = vmul.f32 %v2435_v41, %v2433_v40  ;;  %v2470_v56 = vld [vmem:[%s3204_s2 + $0x20] sm:$0xff]  ;;  %v2495_v13 = vld [vmem:[#allocation5 + $0x68] sm:$0xff] }
  0x25   :  { %234 = vadd.xlane.f32.xlu1 %v233_v16  ;;  %v2442_v43 = vld [vmem:[#allocation5 + $0x18] sm:$0xff]  ;;  %v300_v44 = vsel %vm205_vm0, %v264_v37, 0.0  ;;  %v2472_v57 = vld [vmem:[#allocation5 + $0x20] sm:$0xff]  ;;  %v201_v59 = vmul.f32 %v2465_v55, %v2463_v54  ;;  %v2500_v14 = vld [vmem:[%s3204_s2 + $0x28] sm:$0xff]  ;;  %v202_v17 = vmul.f32 %v2495_v13, %v2493_v12 }
  0x26   :  { %v276_v46 = vsel %vm205_vm0, %v256_v39, 0.0  ;;  %v192_v47 = vmul.f32 %v2442_v43, %v2440_v42  ;;  %v2450_v48 = vld [vmem:[#allocation2 + $0x58] sm:$0xff]  ;;  %v239_v50 = vsel %vm205_vm0, %v200_v45, 0.0  ;;  %v193_v61 = vmul.f32 %v2472_v57, %v2470_v56  ;;  %v2480_v62 = vld [vmem:[#allocation2 + $0x60] sm:$0xff]  ;;  %v2502_v15 = vld [vmem:[#allocation5 + $0x28] sm:$0xff] }
  0x27   :  { %210 = vadd.xlane.f32.xlu0 %v209_v18  ;;  %v2452_v49 = vld [vmem:[#allocation2 + $0x18] sm:$0xff]  ;;  %v265_v51 = vmul.f32 %v2450_v48, %v2450_v48  ;;  %v2482_v63 = vld [vmem:[#allocation2 + $0x20] sm:$0xff]  ;;  %v242_v2 = vsel %vm205_vm0, %v201_v59, 0.0  ;;  %v266_v3 = vmul.f32 %v2480_v62, %v2480_v62  ;;  %v194_v19 = vmul.f32 %v2502_v15, %v2500_v14  ;;  %v2512_v23 = vld [vmem:[#allocation2 + $0x28] sm:$0xff] }
  0x28   :  { %v215_v52 = vsel %vm205_vm0, %v192_v47, 0.0  ;;  %v257_v53 = vmul.f32 %v2452_v49, %v2452_v49  ;;  %v218_v7 = vsel %vm205_vm0, %v193_v61, 0.0  ;;  %v258_v8 = vmul.f32 %v2482_v63, %v2482_v63  ;;  %v2525_v33 = vld [vmem:[#allocation5 + $0x70] sm:$0xff]  ;;  %v2555_v59 = vld [vmem:[#allocation5 + $0x78] sm:$0xff] }
  0x29   :  { %274 = vadd.xlane.f32.xlu1 %v273_v22  ;;  %v303_v58 = vsel %vm205_vm0, %v265_v51, 0.0  ;;  %v306_v16 = vsel %vm205_vm0, %v266_v3, 0.0  ;;  %v2510_v22 = vld [vmem:[#allocation2 + $0x68] sm:$0xff]  ;;  %v259_v31 = vmul.f32 %v2512_v23, %v2512_v23  ;;  %v2532_v37 = vld [vmem:[#allocation5 + $0x30] sm:$0xff]  ;;  %v2560_v61 = vld [vmem:[#allocation5 + $0x38] sm:$0xff] }
  0x2a   :  { %v279_v60 = vsel %vm205_vm0, %v257_v53, 0.0  ;;  %v282_v18 = vsel %vm205_vm0, %v258_v8, 0.0  ;;  %v267_v25 = vmul.f32 %v2510_v22, %v2510_v22  ;;  %v2542_v47 = vld [vmem:[#allocation2 + $0x30] sm:$0xff] }
  0x2b   :  { %271 = vadd.xlane.f32.xlu0 %v270_v24  ;;  %v245_v24 = vsel %vm205_vm0, %v202_v17, 0.0  ;;  %v260_v53 = vmul.f32 %v2542_v47, %v2542_v47  ;;  %v164_v17 = vld [vmem:[#allocation2 + $0x38] sm:$0xff] }
  0x2d   :  { %298 = vadd.xlane.f32.xlu1 %v297_v30  ;;  %v221_v30 = vsel %vm205_vm0, %v194_v19, 0.0 }
  0x2f   :  { %295 = vadd.xlane.f32.xlu0 %v294_v32  ;;  %v2523_v32 = vld [vmem:[%s3204_s2 + $0x70] sm:$0xff] }
  0x30   :  { %v203_v39 = vmul.f32 %v2525_v33, %v2523_v32 }
  0x31   :  { %237 = vadd.xlane.f32.xlu1 %v236_v36  ;;  %v2530_v36 = vld [vmem:[%s3204_s2 + $0x30] sm:$0xff] }
  0x32   :  { %v195_v45 = vmul.f32 %v2532_v37, %v2530_v36 }
  0x33   :  { %213 = vadd.xlane.f32.xlu0 %v212_v38  ;;  %v309_v38 = vsel %vm205_vm0, %v267_v25, 0.0  ;;  %v261_v25 = vmul.f32 %v164_v17, %v164_v17 }
  0x35   :  { %301 = vadd.xlane.f32.xlu1 %v300_v44  ;;  %v285_v44 = vsel %vm205_vm0, %v259_v31, 0.0  ;;  %v291_v31 = vsel %vm205_vm0, %v261_v25, 0.0 }
  0x37   :  { %277 = vadd.xlane.f32.xlu0 %v276_v46  ;;  %v2540_v46 = vld [vmem:[#allocation2 + $0x70] sm:$0xff] }
  0x38   :  { %v268_v51 = vmul.f32 %v2540_v46, %v2540_v46 }
  0x39   :  { %240 = vadd.xlane.f32.xlu1 %v239_v50  ;;  %v248_v50 = vsel %vm205_vm0, %v203_v39, 0.0  ;;  %v133_v39 = vld [vmem:[%s3207_s5 + $0x38] sm:$0xff] }
  0x3a   :  { %2107 = vmatprep.subr.mxu1 %v133_v39 }
  0x3b   :  { %216 = vadd.xlane.f32.xlu0 %v215_v52  ;;  %v224_v52 = vsel %vm205_vm0, %v195_v45, 0.0  ;;  %v132_v45 = vld [vmem:[%s3207_s5 + $0x30] sm:$0xff]  ;;  %2108 = vmatpush3.msra.mxu1 %v133_v39 }
  0x3c   :  { %2109 = vmatprep.subr.mxu1 %v132_v45 }
  0x3d   :  { %304 = vadd.xlane.f32.xlu1 %v303_v58  ;;  %v2553_v58 = vld [vmem:[%s3204_s2 + $0x78] sm:$0xff]  ;;  %2110 = vmatpush3.msra.mxu1 %v132_v45 }
  0x3e   :  { %v204_v3 = vmul.f32 %v2555_v59, %v2553_v58 }
  0x3f   :  { %280 = vadd.xlane.f32.xlu0 %v279_v60  ;;  %v148_v60 = vld [vmem:[%s3204_s2 + $0x38] sm:$0xff] }
  0x40   :  { %v196_v8 = vmul.f32 %v2560_v61, %v148_v60 }
  0x41   :  { %243 = vadd.xlane.f32.xlu1 %v242_v2  ;;  %v312_v2 = vsel %vm205_vm0, %v268_v51, 0.0  ;;  %v131_v51 = vld [vmem:[%s3207_s5 + $0x28] sm:$0xff] }
  0x42   :  { %2111 = vmatprep.subr.mxu1 %v131_v51 }
  0x43   :  { %219 = vadd.xlane.f32.xlu0 %v218_v7  ;;  %v288_v7 = vsel %vm205_vm0, %v260_v53, 0.0  ;;  %v130_v53 = vld [vmem:[%s3207_s5 + $0x20] sm:$0xff]  ;;  %2112 = vmatpush3.msra.mxu1 %v131_v51 }
  0x44   :  { %2113 = vmatprep.subr.mxu1 %v130_v53 }
  0x45   :  { %307 = vadd.xlane.f32.xlu1 %v306_v16  ;;  %v2567_v16 = vld [vmem:[#allocation2 + $0x78] sm:$0xff]  ;;  %2114 = vmatpush3.msra.mxu1 %v130_v53 }
  0x46   :  { %v269_v19 = vmul.f32 %v2567_v16, %v2567_v16  ;;  %2116 = vmatmul.mubr.msk.f32.vlgmr.msra.gmra.mxu1 %vm205_vm0, %v2379_v11 }
  0x47   :  { %283 = vadd.xlane.f32.xlu0 %v282_v18  ;;  %v251_v18 = vsel %vm205_vm0, %v204_v3, 0.0  ;;  %2118 = vmatprep.mubr.msk.f32.mxu1 %vm205_vm0, %v2422_v35 }
  0x49   :  { %246 = vadd.xlane.f32.xlu1 %v245_v24  ;;  %v227_v24 = vsel %vm205_vm0, %v196_v8, 0.0 }
  0x4a   :  { %2119 = vmatmul.mubr.msk.f32.gmra.mxu1 %vm205_vm0, %v2452_v49 }
  0x4b   :  { %222 = vadd.xlane.f32.xlu0 %v221_v30  ;;  %v315_v30 = vsel %vm205_vm0, %v269_v19, 0.0  ;;  %2121 = vmatprep.mubr.msk.f32.mxu1 %vm205_vm0, %v2482_v63 }
  0x4d   :  { %310 = vadd.xlane.f32.xlu1 %v309_v38  ;;  %v129_v38 = vld [vmem:[%s3207_s5 + $0x18] sm:$0xff] }
  0x4e   :  { %2051 = vmatprep.subr.mxu0 %v129_v38  ;;  %2122 = vmatmul.mubr.msk.f32.gmra.mxu1 %vm205_vm0, %v2512_v23 }
  0x4f   :  { %286 = vadd.xlane.f32.xlu0 %v285_v44  ;;  %v128_v44 = vld [vmem:[%s3207_s5 + $0x10] sm:$0xff]  ;;  %2052 = vmatpush3.msra.mxu0 %v129_v38 }
  0x50   :  { %2053 = vmatprep.subr.mxu0 %v128_v44  ;;  %2124 = vmatprep.mubr.msk.f32.mxu1 %vm205_vm0, %v2542_v47 }
  0x51   :  { %249 = vadd.xlane.f32.xlu1 %v248_v50  ;;  %2054 = vmatpush3.msra.mxu0 %v128_v44  ;;  %v127_v50 = vld [vmem:[%s3207_s5 + $0x8] sm:$0xff] }
  0x52   :  { %2055 = vmatprep.subr.mxu0 %v127_v50  ;;  %2125 = vmatmul.mubr.msk.f32.gmra.mxu1 %vm205_vm0, %v164_v17 }
  0x53   :  { %225 = vadd.xlane.f32.xlu0 %v224_v52  ;;  %v126_v52 = vld [vmem:[%s3207_s5] sm:$0xff]  ;;  %2056 = vmatpush3.msra.mxu0 %v127_v50 }
  0x54   :  { %2057 = vmatprep.subr.mxu0 %v126_v52  ;;  %2127 = vmatprep.mubr.msk.f32.mxu1 %vm205_vm0, %v2392_v21 }
  0x55   :  { %313 = vadd.xlane.f32.xlu1 %v312_v2  ;;  %2058 = vmatpush3.msra.mxu0 %v126_v52 }
  0x56   :  { %2060 = vmatmul.mubr.msk.f32.vlgmr.msra.gmra.mxu0 %vm205_vm0, %v2375_v9  ;;  %2128 = vmatmul.mubr.msk.f32.gmra.mxu1 %vm205_vm0, %v2390_v20 }
  0x57   :  { %289 = vadd.xlane.f32.xlu0 %v288_v7  ;;  %2062 = vmatprep.mubr.msk.f32.mxu0 %vm205_vm0, %v2410_v28 }
  0x58   :  { %2130 = vmatprep.mubr.msk.f32.mxu1 %vm205_vm0, %v2420_v34 }
  0x59   :  { %252 = vadd.xlane.f32.xlu1 %v251_v18 }
  0x5a   :  { %2063 = vmatmul.mubr.msk.f32.gmra.mxu0 %vm205_vm0, %v2440_v42  ;;  %2131 = vmatmul.mubr.msk.f32.gmra.mxu1 %vm205_vm0, %v2450_v48 }
  0x5b   :  { %228 = vadd.xlane.f32.xlu0 %v227_v24  ;;  %2065 = vmatprep.mubr.msk.f32.mxu0 %vm205_vm0, %v2470_v56 }
  0x5c   :  { %2133 = vmatprep.mubr.msk.f32.mxu1 %vm205_vm0, %v2480_v62 }
  0x5d   :  { %316 = vadd.xlane.f32.xlu1 %v315_v30 }
  0x5e   :  { %2066 = vmatmul.mubr.msk.f32.gmra.mxu0 %vm205_vm0, %v2500_v14  ;;  %2134 = vmatmul.mubr.msk.f32.gmra.mxu1 %vm205_vm0, %v2510_v22 }
  0x5f   :  { %292 = vadd.xlane.f32.xlu0 %v291_v31  ;;  %2068 = vmatprep.mubr.msk.f32.mxu0 %vm205_vm0, %v2530_v36 }
  0x60   :  { %2136 = vmatprep.mubr.msk.f32.mxu1 %vm205_vm0, %v2540_v46 }
  0x62   :  { %2069 = vmatmul.mubr.msk.f32.gmra.mxu0 %vm205_vm0, %v148_v60  ;;  %2137 = vmatmul.mubr.msk.f32.gmra.mxu1 %vm205_vm0, %v2567_v16 }
  0x63   :  { %2071 = vmatprep.mubr.msk.f32.mxu0 %vm205_vm0, %v2350_v0 }
  0x66   :  { %2072 = vmatmul.mubr.msk.f32.gmra.mxu0 %vm205_vm0, %v2364_v5 }
  0x67   :  { %2074 = vmatprep.mubr.msk.f32.mxu0 %vm205_vm0, %v2403_v26 }
  0x6a   :  { %2075 = vmatmul.mubr.msk.f32.gmra.mxu0 %vm205_vm0, %v2433_v40 }
  0x6b   :  { %2077 = vmatprep.mubr.msk.f32.mxu0 %vm205_vm0, %v2463_v54  ;;  %v350_v54 = vlaneseq }
  0x6d   :  { %v2689_v62 = vshrl.u32 %v350_v54, 7 }
  0x6e   :  { %2078 = vmatmul.mubr.msk.f32.gmra.mxu0 %vm205_vm0, %v2493_v12 }
  0x6f   :  { %2080 = vmatprep.mubr.msk.f32.mxu0 %vm205_vm0, %v2523_v32 }
  0x72   :  { %2081 = vmatmul.mubr.msk.f32.gmra.mxu0 %vm205_vm0, %v2553_v58 }
  0x73   :  { %2083 = vmatprep.mubr.msk.f32.mxu0 %vm205_vm0, %v2359_v4 }
  0x76   :  { %2084 = vmatmul.mubr.msk.f32.gmra.mxu0 %vm205_vm0, %v2377_v10 }
  0x77   :  { %2086 = vmatprep.mubr.msk.f32.mxu0 %vm205_vm0, %v2412_v29 }
  0x7a   :  { %2087 = vmatmul.mubr.msk.f32.gmra.mxu0 %vm205_vm0, %v2442_v43 }
  0x7b   :  { %2089 = vmatprep.mubr.msk.f32.mxu0 %vm205_vm0, %v2472_v57  ;;  %v351_v57 = vand.u32 127, %v350_v54  ;;  %v139_v54 = vld [vmem:[%s3210_s8] sm:$0x1] }
  0x7e   :  { %2090 = vmatmul.mubr.msk.f32.gmra.mxu0 %vm205_vm0, %v2502_v15 }
  0x7f   :  { %2092 = vmatprep.mubr.msk.f32.mxu0 %vm205_vm0, %v2532_v37 }
  0x82   :  { %2093 = vmatmul.mubr.msk.f32.gmra.mxu0 %vm205_vm0, %v2560_v61 }
  0x83   :  { %2095 = vmatprep.mubr.msk.f32.mxu0 %vm205_vm0, %v2352_v1 }
  0x86   :  { %2096 = vmatmul.mubr.msk.f32.gmra.mxu0 %vm205_vm0, %v2366_v6 }
  0x87   :  { %2098 = vmatprep.mubr.msk.f32.mxu0 %vm205_vm0, %v2405_v27 }
  0x8a   :  { %2099 = vmatmul.mubr.msk.f32.gmra.mxu0 %vm205_vm0, %v2435_v41 }
  0x8b   :  { %2101 = vmatprep.mubr.msk.f32.mxu0 %vm205_vm0, %v2465_v55 }
  0x8e   :  { %2102 = vmatmul.mubr.msk.f32.gmra.mxu0 %vm205_vm0, %v2495_v13  ;;  %v2692_v13 = vsub.s32 %v351_v57, %v2689_v62 }
  0x8f   :  { %2104 = vmatprep.mubr.msk.f32.mxu0 %vm205_vm0, %v2525_v33 }
  0x92   :  { %2105 = vmatmul.mubr.msk.f32.gmra.mxu0 %vm205_vm0, %v2555_v59 }
  0xaa   :  { %v232_v0 = vpop.xlane.xlu1 %231 }
  0xac   :  { %v208_v4 = vpop.xlane.xlu0 %207 }
  0xae   :  { %v235_v1 = vpop.xlane.xlu1 %234 }
  0xb0   :  { %v211_v5 = vpop.xlane.xlu0 %210 }
  0xb2   :  { %v275_v6 = vpop.xlane.xlu1 %274 }
  0xb3   :  { %v2694_v14 = vadd.f32 %v275_v6, %v211_v5 }
  0xb4   :  { %v272_v9 = vpop.xlane.xlu0 %271 }
  0xb5   :  { %v2700_v23 = vadd.f32 %v272_v9, %v208_v4  ;;  %v359_v47 = vrot.slane %v2694_v14, %v2692_v13 }
  0xb6   :  { %v299_v10 = vpop.xlane.xlu1 %298 }
  0xb7   :  { %v2696_v15 = vadd.f32 %v299_v10, %v235_v1  ;;  %v355_v7 = vrot.slane %v2700_v23, %v2692_v13 }
  0xb8   :  { %v296_v11 = vpop.xlane.xlu0 %295 }
  0xb9   :  { %v2698_v22 = vadd.f32 %v296_v11, %v232_v0  ;;  %v391_v60 = vrot.slane %v2696_v15, %v2692_v13  ;;  %v417_v50 = vsel %vm416_vm1, %v359_v47, %v355_v7 }
  0xba   :  { %v238_v20 = vpop.xlane.xlu1 %237 }
  0xbb   :  { %v387_v61 = vrot.slane %v2698_v22, %v2692_v13 }
  0xbc   :  { %v214_v21 = vpop.xlane.xlu0 %213 }
  0xbd   :  { %v430_v39 = vsel %vm416_vm1, %v391_v60, %v387_v61  ;;  %v137_v60 = vld [vmem:[%s3208_s6 + $0x18] sm:$0xff]  ;;  %v136_v61 = vld [vmem:[%s3208_s6 + $0x10] sm:$0xff] }
  0xbe   :  { %v302_v26 = vpop.xlane.xlu1 %301  ;;  %2139 = vmatprep.subr.mxu1 %v137_v60 }
  0xbf   :  { %v2702_v32 = vadd.f32 %v302_v26, %v238_v20  ;;  %2140 = vmatpush3.msra.mxu1 %v137_v60 }
  0xc0   :  { %v278_v27 = vpop.xlane.xlu0 %277  ;;  %2141 = vmatprep.subr.mxu1 %v136_v61 }
  0xc1   :  { %v2704_v36 = vadd.f32 %v278_v27, %v214_v21  ;;  %v395_v8 = vrot.slane %v2702_v32, %v2692_v13  ;;  %2142 = vmatpush3.msra.mxu1 %v136_v61 }
  0xc2   :  { %v241_v28 = vpop.xlane.xlu1 %240 }
  0xc3   :  { %v363_v19 = vrot.slane %v2704_v36, %v2692_v13  ;;  %v431_v51 = vsel %vm418_vm2, %v395_v8, %v430_v39 }
  0xc4   :  { %v217_v29 = vpop.xlane.xlu0 %216 }
  0xc5   :  { %v419_v4 = vsel %vm418_vm2, %v363_v19, %v417_v50 }
  0xc6   :  { %v305_v34 = vpop.xlane.xlu1 %304 }
  0xc7   :  { %v2706_v37 = vadd.f32 %v305_v34, %v241_v28 }
  0xc8   :  { %v281_v35 = vpop.xlane.xlu0 %280 }
  0xc9   :  { %v2710_v58 = vadd.f32 %v281_v35, %v217_v29  ;;  %v399_v24 = vrot.slane %v2706_v37, %v2692_v13 }
  0xca   :  { %v244_v40 = vpop.xlane.xlu1 %243 }
  0xcb   :  { %v367_v31 = vrot.slane %v2710_v58, %v2692_v13  ;;  %v432_v1 = vsel %vm420_vm3, %v399_v24, %v431_v51  ;;  %v135_v24 = vld [vmem:[%s3208_s6 + $0x8] sm:$0xff] }
  0xcc   :  { %v220_v41 = vpop.xlane.xlu0 %219  ;;  %2143 = vmatprep.subr.mxu1 %v135_v24 }
  0xcd   :  { %v421_v10 = vsel %vm420_vm3, %v367_v31, %v419_v4  ;;  %2144 = vmatpush3.msra.mxu1 %v135_v24 }
  0xce   :  { %v308_v42 = vpop.xlane.xlu1 %307 }
  0xcf   :  { %v2712_v59 = vadd.f32 %v308_v42, %v244_v40 }
  0xd0   :  { %v284_v43 = vpop.xlane.xlu0 %283 }
  0xd1   :  { %v2718_v2 = vadd.f32 %v284_v43, %v220_v41  ;;  %v403_v38 = vrot.slane %v2712_v59, %v2692_v13 }
  0xd2   :  { %v247_v48 = vpop.xlane.xlu1 %246 }
  0xd3   :  { %v371_v44 = vrot.slane %v2718_v2, %v2692_v13  ;;  %v433_v11 = vsel %vm422_vm4, %v403_v38, %v432_v1 }
  0xd4   :  { %v223_v49 = vpop.xlane.xlu0 %222 }
  0xd5   :  { %v423_v21 = vsel %vm422_vm4, %v371_v44, %v421_v10  ;;  %v134_v44 = vld [vmem:[%s3208_s6] sm:$0xff] }
  0xd6   :  { %v311_v55 = vpop.xlane.xlu1 %310  ;;  %2145 = vmatprep.subr.mxu1 %v134_v44 }
  0xd7   :  { %v2720_v3 = vadd.f32 %v311_v55, %v247_v48  ;;  %v2289_v48 = vmov 0   ;;  %2146 = vmatpush3.msra.mxu1 %v134_v44 }
  0xd8   :  { %v287_v56 = vpop.xlane.xlu0 %286  ;;  %2178 = vset.pattern.permute.xlu1 %v2289_v48  ;;  %2177 = vset.pattern.permute.xlu0 %v2289_v48 }
  0xd9   :  { %v2726_v16 = vadd.f32 %v287_v56, %v223_v49  ;;  %v407_v45 = vrot.slane %v2720_v3, %v2692_v13  ;;  %v138_v49 = vld [vmem:[%s3209_s7] sm:$0x1]  ;;  %v2781_v56 = vsub.s32 0, %v2689_v62 }
  0xda   :  { %v250_v63 = vpop.xlane.xlu1 %249  ;;  %v140_v55 = vadd.f32 %v139_v54, %v138_v49 }
  0xdb   :  { %v375_v52 = vrot.slane %v2726_v16, %v2692_v13  ;;  %v434_v27 = vsel %vm424_vm5, %v407_v45, %v433_v11 }
  0xdc   :  { %v226_v12 = vpop.xlane.xlu0 %225 }
  0xdd   :  { %v425_v34 = vsel %vm424_vm5, %v375_v52, %v423_v21 }
  0xde   :  { %v314_v33 = vpop.xlane.xlu1 %313 }
  0xdf   :  { %v2728_v17 = vadd.f32 %v314_v33, %v250_v63 }
  0xe0   :  { %v290_v46 = vpop.xlane.xlu0 %289 }
  0xe1   :  { %v2734_v25 = vadd.f32 %v290_v46, %v226_v12  ;;  %v411_v53 = vrot.slane %v2728_v17, %v2692_v13  ;;  %v2786_v12 = vrot.slane %v140_v55, %v2781_v56 }
  0xe2   :  { %v253_v18 = vpop.xlane.xlu1 %252 }
  0xe3   :  { %v379_v5 = vrot.slane %v2734_v25, %v2692_v13  ;;  %v435_v29 = vsel %vm426_vm6, %v411_v53, %v434_v27 }
  0xe4   :  { %v229_v30 = vpop.xlane.xlu0 %228 }
  0xe5   :  { %v427_v40 = vsel %vm426_vm6, %v379_v5, %v425_v34 }
  0xe6   :  { %v317_v0 = vpop.xlane.xlu1 %316 }
  0xe7   :  { %v2755_v6 = vadd.f32 %v317_v0, %v253_v18 }
  0xe8   :  { %v293_v9 = vpop.xlane.xlu0 %292 }
  0xe9   :  { %v2759_v20 = vadd.f32 %v293_v9, %v229_v30  ;;  %v415_v26 = vrot.slane %v2755_v6, %v2692_v13 }
  0xeb   :  { %v383_v28 = vrot.slane %v2759_v20, %v2692_v13  ;;  %v436_v35 = vsel %vm428_vm7, %v415_v26, %v435_v29 }
  0xec   :  { %v443_v41 = vsel %vm439_vm8, %v436_v35, -inf }
  0xed   :  { %v429_v42 = vsel %vm428_vm7, %v383_v28, %v427_v40  ;;  %444 = vmax.xlane.f32.xlu1 %v443_v41 }
  0xee   :  { %v440_v43 = vsel %vm439_vm8, %v429_v42, -inf }
  0xef   :  { %441 = vmax.xlane.f32.xlu0 %v440_v43 }
 0x106   :  { %v2783_v63 = vpop.f32.mrf.mxu1 }
 0x108   :  { %v2789_v47 = vpop.f32.mrf.mxu1 }
 0x10a   :  { %v2799_v19 = vpop.f32.mrf.mxu1 }
 0x10c   :  { %v2806_v39 = vpop.f32.mrf.mxu1 }
 0x10e   :  { %v2813_v0 = vpop.f32.mrf.mxu1 }
 0x110   :  { %v2818_v9 = vpop.f32.mrf.mxu1 }
 0x112   :  { %v2823_v28 = vpop.f32.mrf.mxu1 }
 0x114   :  { %v2828_v40 = vpop.f32.mrf.mxu1 }
 0x116   :  { %v2061_v57 = vpop.f32.mrf.mxu0  ;;  %v2833_v54 = vpop.f32.mrf.mxu1 }
 0x117   :  { %v1341_v33 = vadd.f32 %v2783_v63, %v2061_v57 }
 0x118   :  { %v988_v46 = vpop.f32.mrf.mxu0 }
 0x119   :  { %v1363_v7 = vadd.f32 %v2786_v12, %v1341_v33  ;;  %v1340_v8 = vadd.f32 %v2789_v47, %v988_v46  ;;  %v2838_v46 = vpop.f32.mrf.mxu1 }
 0x11a   :  { %v2064_v18 = vpop.f32.mrf.mxu0 }
 0x11b   :  { %v1362_v30 = vadd.f32 %v2786_v12, %v1340_v8  ;;  %v1343_v31 = vadd.f32 %v2799_v19, %v2064_v18  ;;  %v1379_v45 = vmax.f32 %v1363_v7, 0.0  ;;  %v2843_v24 = vpop.f32.mrf.mxu1 }
 0x11c   :  { %v998_v38 = vpop.f32.mrf.mxu0 }
 0x11d   :  { %v1378_v50 = vmax.f32 %v1362_v30, 0.0  ;;  %v1365_v51 = vadd.f32 %v2786_v12, %v1343_v31  ;;  %v1342_v52 = vadd.f32 %v2806_v39, %v998_v38  ;;  %v2848_v44 = vpop.f32.mrf.mxu1 }
 0x11e   :  { %v2067_v53 = vpop.f32.mrf.mxu0 }
 0x11f   :  { %v1364_v4 = vadd.f32 %v2786_v12, %v1342_v52  ;;  %v1345_v1 = vadd.f32 %v2813_v0, %v2067_v53  ;;  %2147 = vmatprep.mubr.msk.f32.mxu1 %vm205_vm0, %v1378_v50  ;;  %v1381_v10 = vmax.f32 %v1365_v51, 0.0 }
 0x120   :  { %v1008_v5 = vpop.f32.mrf.mxu0  ;;  %2148 = vmatmul.mubr.msk.f32.vlgmr.msra.gmra.mxu1 %vm205_vm0, %v1379_v45 }
 0x121   :  { %v1380_v11 = vmax.f32 %v1364_v4, 0.0  ;;  %v1367_v21 = vadd.f32 %v2786_v12, %v1345_v1  ;;  %v1344_v26 = vadd.f32 %v2818_v9, %v1008_v5  ;;  %v2853_v4 = vpop.f32.mrf.mxu1 }
 0x122   :  { %v2070_v27 = vpop.f32.mrf.mxu0 }
 0x123   :  { %v1366_v29 = vadd.f32 %v2786_v12, %v1344_v26  ;;  %v1347_v34 = vadd.f32 %v2823_v28, %v2070_v27  ;;  %2150 = vmatprep.mubr.msk.f32.mxu1 %vm205_vm0, %v1380_v11  ;;  %v1383_v41 = vmax.f32 %v1367_v21, 0.0  ;;  %v2858_v11 = vpop.f32.mrf.mxu1 }
 0x124   :  { %v1018_v35 = vpop.f32.mrf.mxu0  ;;  %2151 = vmatmul.mubr.msk.f32.gmra.mxu1 %vm205_vm0, %v1381_v10 }
 0x125   :  { %v1382_v42 = vmax.f32 %v1366_v29, 0.0  ;;  %v1369_v43 = vadd.f32 %v2786_v12, %v1347_v34  ;;  %v1346_v48 = vadd.f32 %v2828_v40, %v1018_v35  ;;  %v2863_v35 = vpop.f32.mrf.mxu1 }
 0x126   :  { %v2073_v49 = vpop.f32.mrf.mxu0 }
 0x127   :  { %v1368_v55 = vadd.f32 %v2786_v12, %v1346_v48  ;;  %v1349_v57 = vadd.f32 %v2833_v54, %v2073_v49  ;;  %2153 = vmatprep.mubr.msk.f32.mxu1 %vm205_vm0, %v1382_v42  ;;  %v1385_v60 = vmax.f32 %v1369_v43, 0.0  ;;  %v2868_v48 = vpop.f32.mrf.mxu1 }
 0x128   :  { %v1028_v33 = vpop.f32.mrf.mxu0  ;;  %2154 = vmatmul.mubr.msk.f32.gmra.mxu1 %vm205_vm0, %v1383_v41 }
 0x129   :  { %v1384_v61 = vmax.f32 %v1368_v55, 0.0  ;;  %v1371_v7 = vadd.f32 %v2786_v12, %v1349_v57  ;;  %v1348_v8 = vadd.f32 %v2838_v46, %v1028_v33 }
 0x12a   :  { %v2076_v18 = vpop.f32.mrf.mxu0 }
 0x12b   :  { %v1370_v30 = vadd.f32 %v2786_v12, %v1348_v8  ;;  %v1351_v31 = vadd.f32 %v2843_v24, %v2076_v18  ;;  %2156 = vmatprep.mubr.msk.f32.mxu1 %vm205_vm0, %v1384_v61  ;;  %v1387_v45 = vmax.f32 %v1371_v7, 0.0  ;;  %v2879_v8 = vsub.s32 1, %v2689_v62 }
 0x12c   :  { %v1038_v38 = vpop.f32.mrf.mxu0  ;;  %2157 = vmatmul.mubr.msk.f32.gmra.mxu1 %vm205_vm0, %v1385_v60 }
 0x12d   :  { %v1386_v50 = vmax.f32 %v1370_v30, 0.0  ;;  %v1373_v51 = vadd.f32 %v2786_v12, %v1351_v31  ;;  %v1350_v52 = vadd.f32 %v2848_v44, %v1038_v38  ;;  %v2884_v30 = vsub.s32 4, %v2689_v62 }
 0x12e   :  { %v2079_v53 = vpop.f32.mrf.mxu0 }
 0x12f   :  { %v1372_v1 = vadd.f32 %v2786_v12, %v1350_v52  ;;  %v1353_v5 = vadd.f32 %v2853_v4, %v2079_v53  ;;  %2159 = vmatprep.mubr.msk.f32.mxu1 %vm205_vm0, %v1386_v50  ;;  %v1389_v21 = vmax.f32 %v1373_v51, 0.0  ;;  %v2891_v50 = vsub.s32 5, %v2689_v62 }
 0x130   :  { %v1048_v10 = vpop.f32.mrf.mxu0  ;;  %2160 = vmatmul.mubr.msk.f32.gmra.mxu1 %vm205_vm0, %v1387_v45 }
 0x131   :  { %v1388_v26 = vmax.f32 %v1372_v1, 0.0  ;;  %v1375_v27 = vadd.f32 %v2786_v12, %v1353_v5  ;;  %v1352_v29 = vadd.f32 %v2858_v11, %v1048_v10  ;;  %v2898_v5 = vsub.s32 2, %v2689_v62 }
 0x132   :  { %v2082_v34 = vpop.f32.mrf.mxu0  ;;  %v2901_v10 = vsub.s32 6, %v2689_v62 }
 0x133   :  { %v1374_v41 = vadd.f32 %v2786_v12, %v1352_v29  ;;  %v1355_v42 = vadd.f32 %v2863_v35, %v2082_v34  ;;  %2162 = vmatprep.mubr.msk.f32.mxu1 %vm205_vm0, %v1388_v26  ;;  %v1391_v49 = vmax.f32 %v1375_v27, 0.0 }
 0x134   :  { %v1058_v43 = vpop.f32.mrf.mxu0  ;;  %2163 = vmatmul.mubr.msk.f32.gmra.mxu1 %vm205_vm0, %v1389_v21 }
 0x135   :  { %v1390_v55 = vmax.f32 %v1374_v41, 0.0  ;;  %v1377_v57 = vadd.f32 %v2786_v12, %v1355_v42  ;;  %v1354_v33 = vadd.f32 %v2868_v48, %v1058_v43 }
 0x137   :  { %v1376_v60 = vadd.f32 %v2786_v12, %v1354_v33  ;;  %2165 = vmatprep.mubr.msk.f32.mxu1 %vm205_vm0, %v1390_v55  ;;  %v1393_v61 = vmax.f32 %v1377_v57, 0.0 }
 0x138   :  { %2166 = vmatmul.mubr.msk.f32.gmra.mxu1 %vm205_vm0, %v1391_v49 }
 0x139   :  { %v1392_v7 = vmax.f32 %v1376_v60, 0.0 }
 0x13b   :  { %2168 = vmatprep.mubr.msk.f32.mxu1 %vm205_vm0, %v1392_v7 }
 0x13c   :  { %2169 = vmatmul.mubr.msk.f32.gmra.mxu1 %vm205_vm0, %v1393_v61 }
 0x176   :  { %v445_v31 = vpop.xlane.xlu1 %444 }
 0x177   :  { %v499_v51 = vrot.slane %v445_v31, %v2884_v30  ;;  %v483_v52 = vrot.slane %v445_v31, %v2781_v56  ;;  %v503_v21 = vrot.slane %v445_v31, %v2891_v50  ;;  %v487_v27 = vrot.slane %v445_v31, %v2879_v8 }
 0x178   :  { %v2881_v18 = vpop.xlane.xlu0 %441 }
 0x179   :  { %v451_v38 = vrot.slane %v2881_v18, %v2781_v56  ;;  %v455_v45 = vrot.slane %v2881_v18, %v2879_v8  ;;  %v540_v26 = vsub.f32 %v2712_v59, %v499_v51  ;;  %v536_v29 = vsub.f32 %v2698_v22, %v483_v52 }
 0x17a   :  { %v541_v42 = vsub.f32 %v2720_v3, %v503_v21  ;;  %v537_v49 = vsub.f32 %v2696_v15, %v487_v27  ;;  %v459_v59 = vrot.slane %v2881_v18, %v2898_v5  ;;  %v2916_v22 = vsub.s32 3, %v2689_v62 }
 0x17b   :  { %v528_v53 = vsub.f32 %v2700_v23, %v451_v38  ;;  %v529_v1 = vsub.f32 %v2694_v14, %v455_v45  ;;  %v2908_v23 = vsub.s32 7, %v2689_v62  ;;  %v507_v14 = vrot.slane %v445_v31, %v2901_v10 }
 0x17c   :  { %v568_v43 = vmul.f32 1.442695, %v540_v26  ;;  %v560_v55 = vmul.f32 1.442695, %v536_v29  ;;  %v570_v60 = vmul.f32 1.442695, %v541_v42  ;;  %v491_v3 = vrot.slane %v445_v31, %v2898_v5 }
 0x17d   :  { %v544_v34 = vmul.f32 1.442695, %v528_v53  ;;  %v546_v41 = vmul.f32 1.442695, %v529_v1  ;;  %v511_v57 = vrot.slane %v445_v31, %v2908_v23  ;;  %v542_v33 = vsub.f32 %v2728_v17, %v507_v14 }
 0x17e   :  { %v562_v61 = vmul.f32 1.442695, %v537_v49  ;;  %v530_v15 = vsub.f32 %v2704_v36, %v459_v59  ;;  %v538_v45 = vsub.f32 %v2702_v32, %v491_v3  ;;  %v463_v62 = vrot.slane %v2881_v18, %v2916_v22 }
 0x17f   :  { %2179 = vpow2.f32 %v544_v34  ;;  %v543_v7 = vsub.f32 %v2755_v6, %v511_v57  ;;  %v572_v38 = vmul.f32 1.442695, %v542_v33  ;;  %v495_v53 = vrot.slane %v445_v31, %v2916_v22 }
 0x180   :  { %2181 = vpow2.f32 %v546_v41  ;;  %v548_v51 = vmul.f32 1.442695, %v530_v15  ;;  %v564_v1 = vmul.f32 1.442695, %v538_v45  ;;  %v531_v36 = vsub.f32 %v2710_v58, %v463_v62 }
 0x181   :  { %2183 = vpow2.f32 %v568_v43  ;;  %v574_v17 = vmul.f32 1.442695, %v543_v7  ;;  %v539_v21 = vsub.f32 %v2706_v37, %v495_v53  ;;  %v467_v26 = vrot.slane %v2881_v18, %v2884_v30 }
 0x182   :  { %2185 = vpow2.f32 %v560_v55  ;;  %v550_v31 = vmul.f32 1.442695, %v531_v36  ;;  %v471_v34 = vrot.slane %v2881_v18, %v2891_v50  ;;  %v475_v42 = vrot.slane %v2881_v18, %v2901_v10 }
 0x183   :  { %2187 = vpow2.f32 %v570_v60  ;;  %v566_v29 = vmul.f32 1.442695, %v539_v21  ;;  %v532_v41 = vsub.f32 %v2718_v2, %v467_v26  ;;  %v479_v59 = vrot.slane %v2881_v18, %v2908_v23 }
 0x184   :  { %2189 = vpow2.f32 %v562_v61  ;;  %v533_v43 = vsub.f32 %v2726_v16, %v471_v34  ;;  %v534_v57 = vsub.f32 %v2734_v25, %v475_v42 }
 0x185   :  { %2191 = vpow2.f32 %v572_v38  ;;  %v552_v49 = vmul.f32 1.442695, %v532_v41  ;;  %v535_v16 = vsub.f32 %v2759_v20, %v479_v59 }
 0x186   :  { %2193 = vpow2.f32 %v548_v51  ;;  %v554_v33 = vmul.f32 1.442695, %v533_v43  ;;  %v556_v3 = vmul.f32 1.442695, %v534_v57 }
 0x187   :  { %2195 = vpow2.f32 %v574_v17  ;;  %v558_v18 = vmul.f32 1.442695, %v535_v16 }
 0x188   :  { %2197 = vpow2.f32 %v564_v1 }
 0x189   :  { %2199 = vpow2.f32 %v550_v31 }
 0x18a   :  { %2201 = vpow2.f32 %v566_v29 }
 0x18b   :  { %2203 = vpow2.f32 %v552_v49 }
 0x18c   :  { %v2926_v52 = vpop.eup %2179  ;;  %2205 = vpow2.f32 %v554_v33 }
 0x18d   :  { %v2930_v6 = vpop.eup %2181  ;;  %593 = vperm.xlu0 %2177, %v2926_v52   ;;  %2207 = vpow2.f32 %v556_v3 }
 0x18e   :  { %596 = vperm.xlu1 %2178, %v2930_v6   ;;  %v2934_v32 = vpop.eup %2183  ;;  %2209 = vpow2.f32 %v558_v18 }
 0x18f   :  { %v2939_v27 = vpop.eup %2185 }
 0x190   :  { %v2943_v58 = vpop.eup %2187 }
 0x191   :  { %629 = vperm.xlu0 %2177, %v2934_v32   ;;  %v2948_v37 = vpop.eup %2189 }
 0x192   :  { %617 = vperm.xlu1 %2178, %v2939_v27   ;;  %v2952_v14 = vpop.eup %2191 }
 0x193   :  { %v2957_v55 = vpop.eup %2193 }
 0x194   :  { %v2961_v2 = vpop.eup %2195 }
 0x195   :  { %632 = vperm.xlu0 %2177, %v2943_v58   ;;  %v2966_v60 = vpop.eup %2197 }
 0x196   :  { %620 = vperm.xlu1 %2178, %v2948_v37   ;;  %v2971_v61 = vpop.eup %2199 }
 0x197   :  { %v2974_v15 = vpop.eup %2201 }
 0x198   :  { %v2977_v25 = vpop.eup %2203 }
 0x199   :  { %635 = vperm.xlu0 %2177, %v2952_v14   ;;  %v2980_v7 = vpop.eup %2205 }
 0x19a   :  { %599 = vperm.xlu1 %2178, %v2957_v55   ;;  %v2983_v20 = vpop.eup %2207 }
 0x19b   :  { %v2986_v38 = vpop.eup %2209 }
 0x19d   :  { %638 = vperm.xlu0 %2177, %v2961_v2  }
 0x19e   :  { %623 = vperm.xlu1 %2178, %v2966_v60  }
 0x1a2   :  { %602 = vperm.xlu1 %2178, %v2971_v61  }
 0x1a6   :  { %626 = vperm.xlu1 %2178, %v2974_v15  }
 0x1aa   :  { %605 = vperm.xlu1 %2178, %v2977_v25  }
 0x1ae   :  { %608 = vperm.xlu1 %2178, %v2980_v7  }
 0x1b2   :  { %611 = vperm.xlu1 %2178, %v2983_v20  }
 0x1b6   :  { %614 = vperm.xlu1 %2178, %v2986_v38  }
 0x208   :  { %v594_v62 = vpop.permute.xlu0 %593 }
 0x209   :  { %v597_v45 = vpop.permute.xlu1 %596 }
 0x20c   :  { %v630_v17 = vpop.permute.xlu0 %629 }
 0x20d   :  { %v618_v51 = vpop.permute.xlu1 %617  ;;  %v691_v59 = vrot.slane %v630_v17, %v2692_v13 }
 0x20e   :  { %v675_v41 = vrot.slane %v618_v51, %v2692_v13 }
 0x210   :  { %v633_v36 = vpop.permute.xlu0 %632 }
 0x211   :  { %v621_v53 = vpop.permute.xlu1 %620  ;;  %v695_v16 = vrot.slane %v633_v36, %v2692_v13  ;;  %v647_v36 = vrot.slane %v597_v45, %v2692_v13 }
 0x212   :  { %v679_v29 = vrot.slane %v621_v53, %v2692_v13 }
 0x214   :  { %v636_v26 = vpop.permute.xlu0 %635  ;;  %v711_v43 = vsel %vm416_vm1, %v679_v29, %v675_v41 }
 0x215   :  { %v600_v1 = vpop.permute.xlu1 %599  ;;  %v699_v18 = vrot.slane %v636_v26, %v2692_v13 }
 0x216   :  { %v651_v26 = vrot.slane %v600_v1, %v2692_v13 }
 0x218   :  { %v639_v33 = vpop.permute.xlu0 %638 }
 0x219   :  { %v624_v21 = vpop.permute.xlu1 %623  ;;  %v703_v51 = vrot.slane %v639_v33, %v2692_v13 }
 0x21a   :  { %v683_v34 = vrot.slane %v624_v21, %v2692_v13 }
 0x21c   :  { %v712_v57 = vsel %vm418_vm2, %v683_v34, %v711_v43  ;;  %v643_v43 = vrot.slane %v594_v62, %v2692_v13 }
 0x21d   :  { %v603_v31 = vpop.permute.xlu1 %602 }
 0x21e   :  { %v704_v33 = vsel %vm416_vm1, %v647_v36, %v643_v43 }
 0x221   :  { %v627_v42 = vpop.permute.xlu1 %626 }
 0x222   :  { %v687_v49 = vrot.slane %v627_v42, %v2692_v13 }
 0x224   :  { %v713_v3 = vsel %vm420_vm3, %v687_v49, %v712_v57  ;;  %v655_v49 = vrot.slane %v603_v31, %v2692_v13 }
 0x225   :  { %v714_v53 = vsel %vm422_vm4, %v691_v59, %v713_v3  ;;  %v606_v21 = vpop.permute.xlu1 %605  ;;  %v705_v3 = vsel %vm418_vm2, %v651_v26, %v704_v33 }
 0x226   :  { %v715_v29 = vsel %vm424_vm5, %v695_v16, %v714_v53  ;;  %v659_v59 = vrot.slane %v606_v21, %v2692_v13  ;;  %v706_v45 = vsel %vm420_vm3, %v655_v49, %v705_v3 }
 0x227   :  { %v716_v41 = vsel %vm426_vm6, %v699_v18, %v715_v29 }
 0x228   :  { %v717_v17 = vsel %vm428_vm7, %v703_v51, %v716_v41  ;;  %v707_v62 = vsel %vm422_vm4, %v659_v59, %v706_v45 }
 0x229   :  { %v609_v42 = vpop.permute.xlu1 %608  ;;  %v723_v34 = vsel %vm439_vm8, %v717_v17, 0.0 }
 0x22a   :  { %724 = vadd.xlane.f32.xlu0 %v723_v34  ;;  %v663_v16 = vrot.slane %v609_v42, %v2692_v13 }
 0x22c   :  { %v708_v1 = vsel %vm424_vm5, %v663_v16, %v707_v62 }
 0x22d   :  { %v612_v57 = vpop.permute.xlu1 %611 }
 0x22e   :  { %v667_v18 = vrot.slane %v612_v57, %v2692_v13 }
 0x230   :  { %v709_v21 = vsel %vm426_vm6, %v667_v18, %v708_v1  ;;  %v2085_v1 = vpop.f32.mrf.mxu0 }
 0x231   :  { %v615_v53 = vpop.permute.xlu1 %614 }
 0x232   :  { %v671_v31 = vrot.slane %v615_v53, %v2692_v13 }
 0x234   :  { %v710_v51 = vsel %vm428_vm7, %v671_v31, %v709_v21  ;;  %v2149_v21 = vpop.f32.mrf.mxu1 }
 0x235   :  { %v720_v29 = vsel %vm439_vm8, %v710_v51, 0.0 }
 0x236   :  { %721 = vadd.xlane.f32.xlu1 %v720_v29 }
 0x2b3   :  { %v725_v41 = vpop.xlane.xlu0 %724 }
 0x2b4   :  { %2211 = vrcp.f32 %v725_v41 }
 0x2bf   :  { %v722_v17 = vpop.xlane.xlu1 %721 }
 0x2c0   :  { %2213 = vrcp.f32 %v722_v17 }
 0x2c1   :  { %v2212_v42 = vpop.eup %2211 }
 0x2c2   :  { %v769_v49 = vrot.slane %v2212_v42, %v2879_v8  ;;  %v765_v59 = vrot.slane %v2212_v42, %v2781_v56  ;;  %v773_v16 = vrot.slane %v2212_v42, %v2898_v5  ;;  %v781_v18 = vrot.slane %v2212_v42, %v2884_v30 }
 0x2c3   :  { %v785_v45 = vrot.slane %v2212_v42, %v2891_v50  ;;  %v789_v62 = vrot.slane %v2212_v42, %v2901_v10  ;;  %v793_v53 = vrot.slane %v2212_v42, %v2908_v23 }
 0x2c4   :  { %v819_v57 = vmul.f32 %v2948_v37, %v769_v49  ;;  %v818_v33 = vmul.f32 %v2939_v27, %v765_v59 }
 0x2cd   :  { %v2214_v34 = vpop.eup %2213 }
 0x2ce   :  { %v737_v36 = vrot.slane %v2214_v34, %v2879_v8  ;;  %v733_v43 = vrot.slane %v2214_v34, %v2781_v56  ;;  %v741_v3 = vrot.slane %v2214_v34, %v2898_v5  ;;  %v777_v8 = vrot.slane %v2212_v42, %v2916_v22 }
 0x2cf   :  { %v745_v56 = vrot.slane %v2214_v34, %v2916_v22  ;;  %v749_v5 = vrot.slane %v2214_v34, %v2884_v30  ;;  %v753_v22 = vrot.slane %v2214_v34, %v2891_v50  ;;  %v757_v30 = vrot.slane %v2214_v34, %v2901_v10  ;;  %v1068_v10 = vpop.f32.mrf.mxu0 }
 0x2d0   :  { %v811_v26 = vmul.f32 %v2930_v6, %v737_v36  ;;  %v810_v13 = vmul.f32 %v2926_v52, %v733_v43  ;;  %v820_v6 = vmul.f32 %v2966_v60, %v773_v16  ;;  %v812_v52 = vmul.f32 %v2957_v55, %v741_v3 }
 0x2d1   :  { %v821_v37 = vmul.f32 %v2974_v15, %v777_v8  ;;  %v813_v27 = vmul.f32 %v2971_v61, %v745_v56  ;;  %v822_v60 = vmul.f32 %v2934_v32, %v781_v18  ;;  %v814_v55 = vmul.f32 %v2977_v25, %v749_v5  ;;  %v2088_v31 = vpop.f32.mrf.mxu0 }
 0x2d2   :  { %1659 = vperm.xlu1 %2178, %v811_v26   ;;  %1654 = vperm.xlu0 %2177, %v810_v13   ;;  %v823_v15 = vmul.f32 %v2943_v58, %v785_v45  ;;  %v815_v61 = vmul.f32 %v2980_v7, %v753_v22  ;;  %v824_v32 = vmul.f32 %v2952_v14, %v789_v62  ;;  %v1540_v14 = vpop.f32.mrf.mxu1 }
 0x2d3   :  { %v816_v25 = vmul.f32 %v2983_v20, %v757_v30  ;;  %v761_v50 = vrot.slane %v2214_v34, %v2908_v23  ;;  %v825_v58 = vmul.f32 %v2961_v2, %v793_v53  ;;  %v1078_v51 = vpop.f32.mrf.mxu0  ;;  %v1394_v8 = vadd.f32 %v2789_v47, %v1068_v10 }
 0x2d4   :  { %v2152_v20 = vpop.f32.mrf.mxu1  ;;  %v1395_v56 = vadd.f32 %v2783_v63, %v2085_v1  ;;  %v1397_v18 = vadd.f32 %v2799_v19, %v2088_v31  ;;  %v1396_v5 = vadd.f32 %v2806_v39, %v1078_v51 }
 0x2d5   :  { %v817_v7 = vmul.f32 %v2986_v38, %v761_v50  ;;  %v2091_v29 = vpop.f32.mrf.mxu0  ;;  %v1410_v47 = vadd.f32 %v1394_v8, %v2786_v12 }
 0x2d6   :  { %1699 = vperm.xlu0 %2177, %v819_v57   ;;  %1694 = vperm.xlu1 %2178, %v818_v33   ;;  %v1550_v17 = vpop.f32.mrf.mxu1  ;;  %v1411_v22 = vadd.f32 %v1395_v56, %v2786_v12 }
 0x2d7   :  { %v1088_v41 = vpop.f32.mrf.mxu0  ;;  %v1619_v53 = vadd.f32 %v1540_v14, %v1410_v47 }
 0x2d8   :  { %v2155_v23 = vpop.f32.mrf.mxu1  ;;  %v1620_v1 = vadd.f32 %v2149_v21, %v1411_v22 }
 0x2d9   :  { %v2094_v42 = vpop.f32.mrf.mxu0 }
 0x2da   :  { %1704 = vperm.xlu0 %2177, %v820_v6   ;;  %1664 = vperm.xlu1 %2178, %v812_v52   ;;  %v1560_v36 = vpop.f32.mrf.mxu1  ;;  %v1401_v63 = vadd.f32 %v2823_v28, %v2094_v42 }
 0x2db   :  { %v1098_v34 = vpop.f32.mrf.mxu0 }
 0x2dc   :  { %v2158_v2 = vpop.f32.mrf.mxu1  ;;  %v1400_v19 = vadd.f32 %v2828_v40, %v1098_v34 }
 0x2dd   :  { %v2097_v43 = vpop.f32.mrf.mxu0 }
 0x2de   :  { %1709 = vperm.xlu0 %2177, %v821_v37   ;;  %1669 = vperm.xlu1 %2178, %v813_v27   ;;  %v3053_v38 = vpop.f32.mrf.mxu1  ;;  %v1403_v6 = vadd.f32 %v2833_v54, %v2097_v43  ;;  %v1416_v10 = vadd.f32 %v1400_v19, %v2786_v12 }
 0x2df   :  { %v1108_v26 = vpop.f32.mrf.mxu0 }
 0x2e0   :  { %v2161_v49 = vpop.f32.mrf.mxu1  ;;  %v1402_v52 = vadd.f32 %v2838_v46, %v1108_v26  ;;  %v1419_v45 = vadd.f32 %v1403_v6, %v2786_v12  ;;  %v1635_v26 = vmax.f32 %v1619_v53, 0.0 }
 0x2e1   :  { %v2100_v13 = vpop.f32.mrf.mxu0 }
 0x2e2   :  { %1714 = vperm.xlu0 %2177, %v822_v60   ;;  %1674 = vperm.xlu1 %2178, %v814_v55   ;;  %v1580_v57 = vpop.f32.mrf.mxu1  ;;  %v1399_v60 = vadd.f32 %v2813_v0, %v2091_v29  ;;  %v1398_v55 = vadd.f32 %v2818_v9, %v1088_v41  ;;  %v1418_v46 = vadd.f32 %v1402_v52, %v2786_v12 }
 0x2e3   :  { %v1118_v59 = vpop.f32.mrf.mxu0  ;;  %v1405_v39 = vadd.f32 %v2843_v24, %v2100_v13  ;;  %v1417_v24 = vadd.f32 %v1401_v63, %v2786_v12 }
 0x2e4   :  { %v2164_v16 = vpop.f32.mrf.mxu1  ;;  %v1404_v54 = vadd.f32 %v2848_v44, %v1118_v59  ;;  %v1412_v44 = vadd.f32 %v1396_v5, %v2786_v12  ;;  %v1415_v62 = vadd.f32 %v1399_v60, %v2786_v12  ;;  %v1414_v28 = vadd.f32 %v1398_v55, %v2786_v12 }
 0x2e5   :  { %v2103_v33 = vpop.f32.mrf.mxu0  ;;  %v3089_v21 = vadd.f32 %v2158_v2, %v1417_v24  ;;  %v64_v24 = vld [vmem:[%s3202_s0 + $0x18] sm:$0x1f] }
 0x2e6   :  { %1719 = vperm.xlu0 %2177, %v823_v15   ;;  %1679 = vperm.xlu1 %2178, %v815_v61   ;;  %v1590_v37 = vpop.f32.mrf.mxu1  ;;  %v1407_v0 = vadd.f32 %v2853_v4, %v2103_v33  ;;  %v1413_v61 = vadd.f32 %v1397_v18, %v2786_v12  ;;  %v1420_v40 = vadd.f32 %v1404_v54, %v2786_v12 }
 0x2e7   :  { %v1128_v3 = vpop.f32.mrf.mxu0  ;;  %v1621_v41 = vadd.f32 %v1550_v17, %v1412_v44  ;;  %v3084_v42 = vadd.f32 %v2155_v23, %v1415_v62  ;;  %v3087_v34 = vadd.f32 %v1560_v36, %v1414_v28  ;;  %v63_v62 = vld [vmem:[%s3202_s0 + $0x10] sm:$0x1f] }
 0x2e8   :  { %v2167_v15 = vpop.f32.mrf.mxu1  ;;  %v1406_v30 = vadd.f32 %v2858_v11, %v1128_v3  ;;  %v1421_v11 = vadd.f32 %v1405_v39, %v2786_v12  ;;  %v1423_v31 = vadd.f32 %v1407_v0, %v2786_v12  ;;  %v1622_v29 = vadd.f32 %v2152_v20, %v1413_v61 }
 0x2e9   :  { %v2106_v27 = vpop.f32.mrf.mxu0  ;;  %v1629_v43 = vadd.f32 %v1590_v37, %v1420_v40  ;;  %v1636_v20 = vmax.f32 %v1620_v1, 0.0  ;;  %v1637_v36 = vmax.f32 %v1621_v41, 0.0  ;;  %v1640_v52 = vmax.f32 %v3084_v42, 0.0 }
 0x2ea   :  { %1724 = vperm.xlu0 %2177, %v824_v32   ;;  %1684 = vperm.xlu1 %2178, %v816_v25   ;;  %v1628_v32 = vadd.f32 %v2161_v49, %v1419_v45  ;;  %v1627_v25 = vadd.f32 %v1580_v57, %v1418_v46  ;;  %v1409_v4 = vadd.f32 %v2863_v35, %v2106_v27  ;;  %v1600_v51 = vpop.f32.mrf.mxu1  ;;  %v1638_v6 = vmax.f32 %v1622_v29, 0.0 }
 0x2eb   :  { %v1138_v9 = vpop.f32.mrf.mxu0  ;;  %v1422_v14 = vadd.f32 %v1406_v30, %v2786_v12  ;;  %v1630_v17 = vadd.f32 %v2164_v16, %v1421_v11  ;;  %v1639_v56 = vmax.f32 %v3087_v34, 0.0  ;;  %v1645_v2 = vmax.f32 %v1629_v43, 0.0  ;;  %v65_v11 = vld [vmem:[%s3202_s0 + $0x20] sm:$0x1f] }
 0x2ec   :  { %v1408_v50 = vadd.f32 %v2868_v48, %v1138_v9  ;;  %v1644_v35 = vmax.f32 %v1628_v32, 0.0  ;;  %v1643_v48 = vmax.f32 %v1627_v25, 0.0  ;;  %v1425_v13 = vadd.f32 %v1409_v4, %v2786_v12  ;;  %v2170_v23 = vpop.f32.mrf.mxu1 }
 0x2ed   :  { %v1642_v27 = vmax.f32 %v3089_v21, 0.0  ;;  %v3100_v16 = vadd.f32 %v3053_v38, %v1416_v10  ;;  %v3102_v18 = vadd.f32 %v2167_v15, %v1423_v31  ;;  %v1646_v45 = vmax.f32 %v1630_v17, 0.0  ;;  %v62_v38 = vld [vmem:[%s3202_s0 + $0x8] sm:$0x1f] }
 0x2ee   :  { %1729 = vperm.xlu0 %2177, %v825_v58   ;;  %1689 = vperm.xlu1 %2178, %v817_v7   ;;  %v1424_v49 = vadd.f32 %v1408_v50, %v2786_v12  ;;  %v61_v12 = vld [vmem:[%s3202_s0] sm:$0x1f]  ;;  %v1610_v54 = vpop.f32.mrf.mxu1  ;;  %v1631_v22 = vadd.f32 %v1600_v51, %v1422_v14  ;;  %v3106_v19 = vadd.f32 %v2170_v23, %v1425_v13  ;;  %v84_v51 = vsel %vm69_vm9, %v63_v62, 0.0  ;;  %v67_v23 = vld [vmem:[%s3202_s0 + $0x30] sm:$0x1f] }
 0x2ef   :  { %v70_v0 = vsel %vm69_vm9, %v61_v12, 0.0  ;;  %v1641_v30 = vmax.f32 %v3100_v16, 0.0  ;;  %v1648_v28 = vmax.f32 %v3102_v18, 0.0  ;;  %v91_v34 = vsel %vm69_vm9, %v64_v24, 0.0 }
 0x2f0   :  { %v3121_v32 = vadd.f32 %v1610_v54, %v1424_v49  ;;  %v1647_v1 = vmax.f32 %v1631_v22, 0.0  ;;  %v1650_v10 = vmax.f32 %v3106_v19, 0.0  ;;  %v71_v31 = vrot.slane %v70_v0, 4  ;;  %v66_v49 = vld [vmem:[%s3202_s0 + $0x28] sm:$0x1f] }
 0x2f1   :  { %v105_v18 = vsel %vm69_vm9, %v66_v49, 0.0  ;;  %v112_v54 = vsel %vm69_vm9, %v67_v23, 0.0 }
 0x34d   :  { %v1660_v58 = vpop.permute.xlu1 %1659  ;;  %v1655_v7 = vpop.permute.xlu0 %1654 }
 0x34e   :  { %v1732_v8 = vmul.f32 %v1655_v7, %v1635_v26  ;;  %v1733_v37 = vmul.f32 %v1660_v58, %v1636_v20  ;;  %v77_v7 = vsel %vm69_vm9, %v62_v38, 0.0 }
 0x350   :  { %v1748_v39 = vsel %vm205_vm0, %v1732_v8, 0.0  ;;  %v1757_v15 = vsel %vm205_vm0, %v1733_v37, 0.0  ;;  %v92_v8 = vrot.slane %v91_v34, 4 }
 0x351   :  { %v1695_v59 = vpop.permute.xlu1 %1694  ;;  %v1700_v57 = vpop.permute.xlu0 %1699 }
 0x352   :  { %v1740_v33 = vmul.f32 %v1695_v59, %v1643_v48  ;;  %v1741_v3 = vmul.f32 %v1700_v57, %v1644_v35  ;;  %v1649_v35 = vmax.f32 %v3121_v32, 0.0  ;;  %v78_v59 = vrot.slane %v77_v7, 4  ;;  %v68_v32 = vld [vmem:[%s3202_s0 + $0x38] sm:$0x1f] }
 0x354   :  { %v1749_v5 = vsel %vm205_vm0, %v1740_v33, 0.0  ;;  %v1758_v46 = vsel %vm205_vm0, %v1741_v3, 0.0  ;;  %v98_v33 = vsel %vm69_vm9, %v65_v11, 0.0  ;;  %v113_v11 = vrot.slane %v112_v54, 4 }
 0x355   :  { %v1665_v60 = vpop.permute.xlu1 %1664  ;;  %v1705_v55 = vpop.permute.xlu0 %1704  ;;  %v1750_v9 = vadd.f32 %v1749_v5, %v1748_v39  ;;  %v1759_v25 = vadd.f32 %v1758_v46, %v1757_v15  ;;  %v106_v15 = vrot.slane %v105_v18, 4 }
 0x356   :  { %v1734_v47 = vmul.f32 %v1665_v60, %v1637_v36  ;;  %v1742_v63 = vmul.f32 %v1705_v55, %v1645_v2  ;;  %v85_v36 = vrot.slane %v84_v51, 4  ;;  %v3148_v55 = vadd.f32 %v78_v59, %v77_v7 }
 0x357   :  { %v1751_v29 = vrot.slane %v1750_v9, 4  ;;  %v1760_v48 = vrot.slane %v1759_v25, 4  ;;  %v107_v59 = vadd.f32 %v106_v15, %v105_v18 }
 0x358   :  { %v1766_v61 = vsel %vm205_vm0, %v1734_v47, 0.0  ;;  %v1767_v44 = vsel %vm205_vm0, %v1742_v63, 0.0  ;;  %v3153_v38 = vadd.f32 %v85_v36, %v84_v51  ;;  %v80_v16 = vrot.slane %v3148_v55, 2 }
 0x359   :  { %v1670_v40 = vpop.permute.xlu1 %1669  ;;  %v1710_v53 = vpop.permute.xlu0 %1709  ;;  %v1768_v4 = vadd.f32 %v1767_v44, %v1766_v61  ;;  %v1752_v2 = vadd.f32 %v1751_v29, %v1750_v9 }
 0x35a   :  { %v1735_v50 = vmul.f32 %v1670_v40, %v1638_v6  ;;  %v1743_v58 = vmul.f32 %v1710_v53, %v1646_v45  ;;  %v3143_v6 = vadd.f32 %v71_v31, %v70_v0  ;;  %v99_v45 = vrot.slane %v98_v33, 4 }
 0x35b   :  { %v1769_v57 = vrot.slane %v1768_v4, 4  ;;  %v3155_v0 = vadd.f32 %v92_v8, %v91_v34  ;;  %v1753_v9 = vrot.slane %v1752_v2, 2  ;;  %v119_v31 = vsel %vm69_vm9, %v68_v32, 0.0 }
 0x35c   :  { %v1775_v41 = vsel %vm205_vm0, %v1735_v50, 0.0  ;;  %v1776_v14 = vsel %vm205_vm0, %v1743_v58, 0.0  ;;  %v73_v40 = vrot.slane %v3143_v6, 2  ;;  %v100_v53 = vadd.f32 %v99_v45, %v98_v33 }
 0x35d   :  { %v1777_v43 = vadd.f32 %v1776_v14, %v1775_v41  ;;  %v1675_v26 = vpop.permute.xlu1 %1674  ;;  %v1715_v13 = vpop.permute.xlu0 %1714  ;;  %v1770_v46 = vadd.f32 %v1769_v57, %v1768_v4  ;;  %v1754_v51 = vadd.f32 %v1753_v9, %v1752_v2  ;;  %v120_v23 = vrot.slane %v119_v31, 4 }
 0x35e   :  { %v1736_v20 = vmul.f32 %v1675_v26, %v1639_v56  ;;  %v1744_v17 = vmul.f32 %v1715_v13, %v1647_v1  ;;  %v1761_v56 = vadd.f32 %v1760_v48, %v1759_v25  ;;  %v94_v19 = vrot.slane %v3155_v0, 2 }
 0x35f   :  { %v1778_v3 = vrot.slane %v1777_v43, 4  ;;  %v1771_v24 = vrot.slane %v1770_v46, 2  ;;  %v1755_v33 = vrot.slane %v1754_v51, 1  ;;  %v121_v45 = vadd.f32 %v120_v23, %v119_v31 }
 0x360   :  { %v1784_v37 = vsel %vm205_vm0, %v1736_v20, 0.0  ;;  %v1785_v12 = vsel %vm205_vm0, %v1744_v17, 0.0  ;;  %v1762_v25 = vrot.slane %v1761_v56, 2  ;;  %v81_v32 = vadd.f32 %v80_v16, %v3148_v55 }
 0x361   :  { %v1680_v5 = vpop.permute.xlu1 %1679  ;;  %v1720_v60 = vpop.permute.xlu0 %1719  ;;  %v1786_v47 = vadd.f32 %v1785_v12, %v1784_v37  ;;  %v1779_v39 = vadd.f32 %v1778_v3, %v1777_v43 }
 0x362   :  { %v1737_v63 = vmul.f32 %v1680_v5, %v1640_v52  ;;  %v1745_v22 = vmul.f32 %v1720_v60, %v1648_v28  ;;  %v1763_v34 = vadd.f32 %v1762_v25, %v1761_v56 }
 0x363   :  { %v1787_v61 = vrot.slane %v1786_v47, 4  ;;  %v1780_v7 = vrot.slane %v1779_v39, 2 }
 0x364   :  { %v1793_v44 = vsel %vm205_vm0, %v1737_v63, 0.0  ;;  %v1794_v62 = vsel %vm205_vm0, %v1745_v22, 0.0  ;;  %v1764_v2 = vrot.slane %v1763_v34, 1  ;;  %v101_v63 = vrot.slane %v100_v53, 2 }
 0x365   :  { %v1795_v42 = vadd.f32 %v1794_v62, %v1793_v44  ;;  %v1685_v52 = vpop.permute.xlu1 %1684  ;;  %v1725_v28 = vpop.permute.xlu0 %1724  ;;  %v1788_v4 = vadd.f32 %v1787_v61, %v1786_v47  ;;  %v1781_v57 = vadd.f32 %v1780_v7, %v1779_v39  ;;  %v108_v22 = vrot.slane %v107_v59, 2 }
 0x366   :  { %v1738_v50 = vmul.f32 %v1685_v52, %v1641_v30  ;;  %v1746_v58 = vmul.f32 %v1725_v28, %v1649_v35  ;;  %v1772_v30 = vadd.f32 %v1771_v24, %v1770_v46  ;;  %v1756_v46 = vadd.f32 %v1755_v33, %v1754_v51 }
 0x367   :  { %v1796_v1 = vrot.slane %v1795_v42, 4  ;;  %v1789_v29 = vrot.slane %v1788_v4, 2  ;;  %v1782_v18 = vrot.slane %v1781_v57, 1  ;;  %v1765_v39 = vadd.f32 %v1764_v2, %v1763_v34 }
 0x368   :  { %v1802_v41 = vsel %vm205_vm0, %v1738_v50, 0.0  ;;  %v1803_v14 = vsel %vm205_vm0, %v1746_v58, 0.0  ;;  %v1773_v21 = vrot.slane %v1772_v30, 1  ;;  %v74_v62 = vadd.f32 %v73_v40, %v3143_v6 }
 0x369   :  { %v1797_v48 = vadd.f32 %v1796_v1, %v1795_v42  ;;  %v1804_v43 = vadd.f32 %v1803_v14, %v1802_v41  ;;  %v1690_v26 = vpop.permute.xlu1 %1689  ;;  %v1730_v13 = vpop.permute.xlu0 %1729  ;;  %v1790_v3 = vadd.f32 %v1789_v29, %v1788_v4  ;;  %v1783_v42 = vadd.f32 %v1782_v18, %v1781_v57 }
 0x36a   :  { %v1739_v35 = vmul.f32 %v1690_v26, %v1642_v27  ;;  %v1747_v49 = vmul.f32 %v1730_v13, %v1650_v10  ;;  %v87_v27 = vrot.slane %v3153_v38, 2  ;;  %v114_v10 = vadd.f32 %v113_v11, %v112_v54 }
 0x36b   :  { %v1798_v20 = vrot.slane %v1797_v48, 2  ;;  %v1805_v17 = vrot.slane %v1804_v43, 4  ;;  %v1791_v47 = vrot.slane %v1790_v3, 1  ;;  %v1774_v44 = vadd.f32 %v1773_v21, %v1772_v30 }
 0x36c   :  { %v1811_v36 = vsel %vm205_vm0, %v1739_v35, 0.0  ;;  %v1812_v8 = vsel %vm205_vm0, %v1747_v49, 0.0  ;;  %v115_v25 = vrot.slane %v114_v10, 2  ;;  %v122_v28 = vrot.slane %v121_v45, 2 }
 0x36d   :  { %v1799_v37 = vadd.f32 %v1798_v20, %v1797_v48  ;;  %v1806_v12 = vadd.f32 %v1805_v17, %v1804_v43  ;;  %v1813_v56 = vadd.f32 %v1812_v8, %v1811_v36  ;;  %v1792_v24 = vadd.f32 %v1791_v47, %v1790_v3  ;;  %v1651_v43 = vld [vmem:[%s3203_s1] sm:$0xff]  ;;  %s2290_s1 = smov [#allocation7]  }
 0x36e   :  { %v88_v4 = vadd.f32 %v87_v27, %v3153_v38  ;;  %v95_v50 = vadd.f32 %v94_v19, %v3155_v0  ;;  %v102_v58 = vadd.f32 %v101_v63, %v100_v53  ;;  %v1828_v7 = vsel %vm416_vm1, %v1765_v39, %v1756_v46  ;;  %s1900_s3 = sshll.u32 %s2290_s1, 4  ;;  %s1901_s3 = int_to_ptr.vmem [resolvable:$true] %s1900_s3 }
 0x36f   :  { %v1807_v5 = vrot.slane %v1806_v12, 2  ;;  %v1814_v60 = vrot.slane %v1813_v56, 4  ;;  %v1800_v15 = vrot.slane %v1799_v37, 1  ;;  %v109_v31 = vadd.f32 %v108_v22, %v107_v59  ;;  %s2259_s22 = scalar_lea.vmem %s1901_s3, 128  ;;  %p2264_p11 = scmp.lt.s32.totalorder %s1901_s3, %s1901_s3 }
 0x370   :  { %v1829_v6 = vsel %vm418_vm2, %v1774_v44, %v1828_v7  ;;  %v75_v55 = vrot.slane %v74_v62, 1  ;;  %v116_v41 = vadd.f32 %v115_v25, %v114_v10  ;;  %v123_v14 = vadd.f32 %v122_v28, %v121_v45  ;;  %p2260_p10 = scmp.ne.s32.totalorder %s1901_s3, %s2259_s22  ;;  %p2265_p12 = scmp.lt.s32.totalorder %s2259_s22, %s2259_s22 }
 0x371   :  { %v1808_v9 = vadd.f32 %v1807_v5, %v1806_v12  ;;  %v1815_v61 = vadd.f32 %v1814_v60, %v1813_v56  ;;  %v1801_v1 = vadd.f32 %v1800_v15, %v1799_v37  ;;  %v1830_v51 = vsel %vm420_vm3, %v1783_v42, %v1829_v6 }
 0x372   :  { %v1831_v34 = vsel %vm422_vm4, %v1792_v24, %v1830_v51  ;;  %v82_v38 = vrot.slane %v81_v32, 1  ;;  %v89_v48 = vrot.slane %v88_v4, 1  ;;  %v96_v0 = vrot.slane %v95_v50, 1  ;;  %p2266_p13 = por %p2265_p12, %p2264_p11 }
 0x373   :  { %v1809_v54 = vrot.slane %v1808_v9, 1  ;;  %v1816_v52 = vrot.slane %v1815_v61, 2  ;;  %v1832_v53 = vsel %vm424_vm5, %v1801_v1, %v1831_v34  ;;  %v103_v13 = vrot.slane %v102_v58, 1 }
 0x374   :  { %v110_v16 = vrot.slane %v109_v31, 1  ;;  %v117_v49 = vrot.slane %v116_v41, 1  ;;  %v124_v59 = vrot.slane %v123_v14, 1  ;;  %v83_v20 = vadd.f32 %v82_v38, %v81_v32  ;;  %p2267_p0 = pnand %p2266_p13, %p2260_p10 }
 0x375   :  { %v1817_v11 = vadd.f32 %v1816_v52, %v1815_v61  ;;  %v1810_v40 = vadd.f32 %v1809_v54, %v1808_v9  ;;  %v90_v17 = vadd.f32 %v89_v48, %v88_v4  ;;  %v97_v23 = vadd.f32 %v96_v0, %v95_v50 }
 0x376   :  { %v76_v33 = vadd.f32 %v75_v55, %v74_v62  ;;  %v104_v3 = vadd.f32 %v103_v13, %v102_v58  ;;  %v111_v36 = vadd.f32 %v110_v16, %v109_v31  ;;  %v118_v56 = vadd.f32 %v117_v49, %v116_v41 }
 0x377   :  { %v1818_v29 = vrot.slane %v1817_v11, 1  ;;  %v1833_v30 = vsel %vm426_vm6, %v1810_v40, %v1832_v53  ;;  %v125_v21 = vadd.f32 %v124_v59, %v123_v14 }
 0x379   :  { %v1819_v26 = vadd.f32 %v1818_v29, %v1817_v11 }
 0x37b   :  { %v1834_v35 = vsel %vm428_vm7, %v1819_v26, %v1833_v30 }
 0x37c   :  { %v1836_v57 = vadd.f32 %v1834_v35, %v1651_v43 }
 0x37e   :  { %v1838_v8 = vrot.slane %v1836_v57, 1  ;;  %v1839_v2 = vrot.slane %v1836_v57, 2  ;;  %v1840_v37 = vrot.slane %v1836_v57, 3  ;;  %v1841_v12 = vrot.slane %v1836_v57, 4 }
 0x37f   :  { %v1842_v27 = vrot.slane %v1836_v57, 5  ;;  %v1843_v19 = vrot.slane %v1836_v57, 6  ;;  %v1844_v10 = vrot.slane %v1836_v57, 7  ;;  %v1853_v46 = vmul.f32 %v1836_v57, %v76_v33 }
 0x380   :  { %v1854_v18 = vmul.f32 %v1838_v8, %v83_v20  ;;  %v1855_v5 = vmul.f32 %v1839_v2, %v90_v17  ;;  %v1856_v60 = vmul.f32 %v1840_v37, %v97_v23  ;;  %v1857_v45 = vmul.f32 %v1841_v12, %v104_v3 }
 0x381   :  { %v1858_v47 = vmul.f32 %v1842_v27, %v111_v36  ;;  %v1859_v39 = vmul.f32 %v1843_v19, %v118_v56  ;;  %v1860_v15 = vmul.f32 %v1844_v10, %v125_v21 }
 0x382   :  { %v1869_v63 = vrot.slane %v1854_v18, 7  ;;  %v1871_v22 = vrot.slane %v1855_v5, 6  ;;  %v1873_v61 = vrot.slane %v1856_v60, 5  ;;  %v1875_v62 = vrot.slane %v1857_v45, 4 }
 0x383   :  { %v1877_v25 = vrot.slane %v1858_v47, 3  ;;  %v1879_v54 = vrot.slane %v1859_v39, 2  ;;  %v1881_v28 = vrot.slane %v1860_v15, 1 }
 0x384   :  { %v1870_v9 = vsel %vm416_vm1, %v1869_v63, %v1853_v46 }
 0x385   :  { %v1872_v44 = vsel %vm418_vm2, %v1871_v22, %v1870_v9 }
 0x386   :  { %v1874_v32 = vsel %vm420_vm3, %v1873_v61, %v1872_v44 }
 0x387   :  { %v1876_v42 = vsel %vm422_vm4, %v1875_v62, %v1874_v32 }
 0x388   :  { %v1878_v52 = vsel %vm424_vm5, %v1877_v25, %v1876_v42 }
 0x389   :  { %v1880_v24 = vsel %vm426_vm6, %v1879_v54, %v1878_v52 }
 0x38a   :  { %v1882_v4 = vsel %vm428_vm7, %v1881_v28, %v1880_v24 }
 0x38b   :  { %v1884_v50 = vsel %vm205_vm0, %v1882_v4, 0.0 }
 0x38c   :  { %1885 = vadd.xlane.f32.xlu1 %v1884_v50 }
 0x415   :  { %v1886_v58 = vpop.xlane.xlu1 %1885 }
 0x416   :  { %v1974_v7 = vmul.f32 -1.442695, %v1886_v58 }
 0x418   :  { %2215 = vpow2.f32 %v1974_v7 }
 0x425   :  { %v2216_v1 = vpop.eup %2215 }
 0x426   :  { %v1890_v11 = vadd.f32 1.0, %v2216_v1 }
 0x428   :  { %2217 = vrcp.f32 %v1890_v11 }
 0x435   :  { %v2218_v31 = vpop.eup %2217 }
 0x436   :  { %1893 = vst [vmem:[#allocation7] sm:$0xff] %v2218_v31 }
 0x437   :  { %2270 = shalt.err (!%p2267_p0)
}
 0x438   :  { %1903 = dma.vmem_to_hbm [thread:$0]  %s1901_s3, 128, %s3211_s9, [#allocation4]  }
 0x439   :  { %2283 = dma.done.wait [#allocation4], 128  }
 0x43a   :  { %2284 = vsyncadd [#allocation4], 4294967168 }
 0x43b   :  { %1907 = vsyncpa [#allocation3], 1 }
 0x43c   :  { %1908 = vsyncpa [#allocation6], 1 }
 0x43d   :  { %1909 = vsyncpa [#allocation4], 1 }

</bundles_post_ra>
